<compile_context>
chip_gen: v7x
topology: tpu7x:2x2x1
jax: 0.10.0
libtpu: 0.0.40
codegen_flags: <defaults>
</compile_context>

<pallas_src>
import functools

import jax
import jax.numpy as jnp
from jax import lax
from jax.experimental import pallas as pl
from jax.experimental.pallas import tpu as pltpu


def _linear_attention_kernel(x_ref, wqkv_ref, wout_ref, bout_ref, g_ref,
                             hmask_ref, o_ref, *, heads, dim_head, n_spatial,
                             batch_block):
    hidden = heads * dim_head
    n = n_spatial

    wqkv = wqkv_ref[...]          # (C, 3*hidden)  lane-dense 1x1-conv weight
    wout = wout_ref[...]          # (C, hidden)
    hmask = hmask_ref[...]        # (hidden, hidden) block-diag * (scale / N)
    c = wout.shape[0]

    # Loop-invariant work hoisted out of the per-image loop (JAX does not CSE
    # broadcast_in_dim, and the bf16 cast of wout is reused by every image).
    bout_b = jnp.broadcast_to(bout_ref[...], (c, n))      # (C, N)
    g_b = jnp.broadcast_to(g_ref[...], (c, n))            # (C, N)
    wout_bf = wout.astype(jnp.bfloat16)

    def per_image(bi):
        x = x_ref[bi]             # (C, N) f32

        # to_qkv 1x1 conv: (C,3H)^T contracted with (C,N) -> (3H, N).
        # K = C = 4 is tiny; keep exact f32 so q/k/v are exact pre-softmax.
        qkv = lax.dot_general(wqkv, x, (((0,), (0,)), ((), ())),
                              preferred_element_type=jnp.float32)

        # Contiguous sublane slabs (offsets multiples of 8) -> free views.
        q = qkv[0:hidden, :]
        k = qkv[hidden:2 * hidden, :]
        v = qkv[2 * hidden:3 * hidden, :]

        # q softmax over dim_head within each head (torch softmax(dim=-2)).
        q3 = q.reshape(heads, dim_head, n)
        q_e = jnp.exp(q3 - jnp.max(q3, axis=1, keepdims=True))
        q_inv = pl.reciprocal(jnp.sum(q_e, axis=1, keepdims=True), approx=True)
        q_s = (q_e * q_inv).reshape(hidden, n)

        # k softmax over spatial N (torch softmax(dim=-1)) — lane reduction.
        k_e = jnp.exp(k - jnp.max(k, axis=-1, keepdims=True))
        k_inv = pl.reciprocal(jnp.sum(k_e, axis=-1, keepdims=True), approx=True)
        k_s = k_e * k_inv

        # All-head context in ONE 128-wide MXU matmul (bf16 in, f32 acc):
        #   full[h*d + e, h'*d + dd] = sum_n v[h, e, n] * k_s[h', dd, n]
        # hmask keeps only the diagonal (h == h') 32x32 blocks and carries the
        # folded (scale / N) factor, so v and q need no extra scaling.
        # (On the 2x256^2-MXU generations (v6e/v7x) two images could be paired
        #  along sublanes into a single 256-wide context/apply pass; not done
        #  here since the default batch_block keeps the grid >= 2 for megacore.)
        full = lax.dot_general(v.astype(jnp.bfloat16), k_s.astype(jnp.bfloat16),
                               (((1,), (1,)), ((), ())),
                               preferred_element_type=jnp.float32)
        ctx_bd = (full * hmask).astype(jnp.bfloat16)       # (hidden, hidden)

        # Apply contexts: o[h*d + e, n] = sum_dd ctx[h, dd, e] * q_s[h*d+dd, n]
        o = jnp.dot(ctx_bd, q_s.astype(jnp.bfloat16),
                    preferred_element_type=jnp.float32)    # (hidden, N) f32

        # to_out 1x1 conv: (C, hidden) @ (hidden, N) + bias (bf16 in, f32 acc).
        out = jnp.dot(wout_bf, o.astype(jnp.bfloat16),
                      preferred_element_type=jnp.float32) + bout_b

        # LayerNorm over channels (torch dim=1), unbiased=False, eps=1e-5, f32.
        mean = jnp.mean(out, axis=0, keepdims=True)
        var = jnp.mean((out - mean) ** 2, axis=0, keepdims=True)
        y = (out - mean) * lax.rsqrt(var + 1e-5) * g_b

        o_ref[bi] = y.astype(o_ref.dtype)

    if batch_block <= 2:
        # Short fixed trip count: full unroll keeps the LLO scheduler's view
        # flat while live intermediates stay bounded (<= 2 images).
        for bi in range(batch_block):
            per_image(bi)
    else:
        # Larger per-step batches: rolled loop bounds live ranges to one image.
        def body(bi, carry):
            per_image(bi)
            return carry
        lax.fori_loop(0, batch_block, body, 0)


def _pick_batch_block(b):
    """Images per grid step.

    Keep the grid length >= 2 so dimension_semantics=("parallel",) can shard
    images across v7x's two TensorCores (on single-TC v5e/v6e the extra grid
    step costs only ~0.35 us), and cap the in-kernel loop at 8 images.
    """
    if b < 2:
        return 1
    cap = min(8, b // 2)
    bb = 1
    for d in range(1, b + 1):
        if b % d == 0 and d <= cap:
            bb = d
    return bb


def _vmem_budget(batch_block, c, n, hidden):
    """Scoped-VMEM budget from the intermediate footprint (not the x block).

    The in-kernel temporaries (qkv slab + softmax/exp/o/out temporaries) are
    ~(3*hidden)/C times larger than the pipelined x block, so budget on them.
    """
    live_images = min(batch_block, 2)           # >2 images use a rolled loop
    per_image = 10 * (3 * hidden) * n * 4       # qkv + ~8 (hidden, N) f32 temps
    io = 4 * batch_block * c * n * 4            # double-buffered in + out blocks
    consts = (4 * hidden * c + hidden * hidden + 2 * c) * 4 * 2
    need = live_images * per_image + io + consts
    # Floor of 32 MiB (ample Mosaic headroom), cap at 48 MiB — below v7x's
    # 64 MiB physical VMEM and well below v5e/v6e's 128 MiB.
    return int(min(48 << 20, max(32 << 20, 2 * need)))


def linear_attention_pallas(x_nchw, wqkv, wout, bout, g, *,
                            heads, dim_head, batch_block=None):
    b, c, hh, ww = x_nchw.shape
    n = hh * ww
    hidden = heads * dim_head
    scale = dim_head ** (-0.5)

    # NCHW -> (B, C, N): pure reshape, no transpose (N stays the lane dim).
    x_tok = x_nchw.reshape(b, c, n).astype(jnp.float32)

    # Lane-dense weight layouts for the tiny 1x1-conv parameters.
    wqkv_cd = jnp.asarray(wqkv, jnp.float32).T            # (C, 3*hidden)
    wout_f = jnp.asarray(wout, jnp.float32)               # (C, hidden)
    bout_f = jnp.asarray(bout, jnp.float32).reshape(c, 1)
    g_f = jnp.asarray(g, jnp.float32).reshape(c, 1)

    # Precomputed block-diagonal head mask with the q scale and 1/N folded in
    # (everything after the softmaxes is linear, so this is exact).
    row_head = jnp.arange(hidden)[:, None] // dim_head
    col_head = jnp.arange(hidden)[None, :] // dim_head
    head_mask = jnp.where(row_head == col_head, scale / n, 0.0
                          ).astype(jnp.float32)           # (hidden, hidden)

    if batch_block is None:
        batch_block = _pick_batch_block(b)
    assert b % batch_block == 0
    grid = (b // batch_block,)

    kernel = functools.partial(_linear_attention_kernel,
                               heads=heads, dim_head=dim_head,
                               n_spatial=n, batch_block=batch_block)

    # NOTE: for the high-resolution UNet stages (N >= 4096) this should become
    # a pipelined reduction over N-tiles: a trailing "arbitrary" grid axis over
    # 128-multiple N-tiles, online (flash-style) k-softmax statistics plus the
    # (hidden, hidden) context accumulated in VMEM scratch with pl.when
    # init/finalize, then a second pass applying the context / projection /
    # LayerNorm per N-tile.  At N = 256 every block is a few KiB, so the whole
    # image stays resident and the budget below is ample.
    out_tok = pl.pallas_call(
        kernel,
        out_shape=jax.ShapeDtypeStruct((b, c, n), jnp.float32),
        grid_spec=pltpu.PrefetchScalarGridSpec(
            num_scalar_prefetch=0,
            grid=grid,
            in_specs=[
                pl.BlockSpec((batch_block, c, n), lambda i: (i, 0, 0)),
                pl.BlockSpec((c, 3 * hidden), lambda i: (0, 0)),
                pl.BlockSpec((c, hidden), lambda i: (0, 0)),
                pl.BlockSpec((c, 1), lambda i: (0, 0)),
                pl.BlockSpec((c, 1), lambda i: (0, 0)),
                pl.BlockSpec((hidden, hidden), lambda i: (0, 0)),
            ],
            out_specs=pl.BlockSpec((batch_block, c, n), lambda i: (i, 0, 0)),
        ),
        compiler_params=pltpu.CompilerParams(
            dimension_semantics=("parallel",),
            vmem_limit_bytes=_vmem_budget(batch_block, c, n, hidden)),
    )(x_tok, wqkv_cd, wout_f, bout_f, g_f, head_mask)

    # (B, C, N) -> NCHW: pure reshape.
    return out_tok.reshape(b, c, hh, ww)


def linear_attention_ref(x, wqkv, wout, bout, g, *, heads, dim_head):
    """Pure-JAX reference replicating the PyTorch forward exactly (f32)."""
    b, c, hh, ww = x.shape
    n = hh * ww
    hidden = heads * dim_head
    xf = x.reshape(b, c, n).astype(jnp.float32)
    qkv = jnp.einsum('oc,bcn->bon', wqkv, xf)                 # (b, 3*hidden, n)
    q, k, v = jnp.split(qkv, 3, axis=1)
    resh = lambda t: t.reshape(b, heads, dim_head, n)
    q, k, v = resh(q), resh(k), resh(v)
    q = jax.nn.softmax(q, axis=-2)
    k = jax.nn.softmax(k, axis=-1)
    q = q * (dim_head ** -0.5)
    v = v / n
    context = jnp.einsum('bhdn,bhen->bhde', k, v)
    o = jnp.einsum('bhde,bhdn->bhen', context, q)
    o = o.reshape(b, hidden, n)
    out = jnp.einsum('ch,bhn->bcn', wout, o) + bout.reshape(1, c, 1)
    mean = jnp.mean(out, axis=1, keepdims=True)
    var = jnp.mean((out - mean) ** 2, axis=1, keepdims=True)
    out = (out - mean) * lax.rsqrt(var + 1e-5) * g.reshape(1, c, 1)
    return out.reshape(b, c, hh, ww)


if __name__ == "__main__":
    # Module config: dim=4, heads=4, dim_head=32 -> hidden_dim=128
    dim, heads, dim_head = 4, 4, 32
    hidden = heads * dim_head
    B, H, W = 2, 16, 16

    key = jax.random.PRNGKey(0)
    k_x, k_qkv, k_wo, k_bo = jax.random.split(key, 4)

    x = jax.random.normal(k_x, (B, dim, H, W), dtype=jnp.float32)

    # to_qkv: Conv2d(dim, 3*hidden, 1, bias=False); weight stored (out, in).
    wqkv = (jax.random.normal(k_qkv, (3 * hidden, dim), dtype=jnp.float32)
            * (1.0 / jnp.sqrt(dim)))
    # to_out[0]: Conv2d(hidden, dim, 1) with bias; weight stored (out, in).
    wout = (jax.random.normal(k_wo, (dim, hidden), dtype=jnp.float32)
            * (1.0 / jnp.sqrt(hidden)))
    bout = jax.random.normal(k_bo, (dim, 1), dtype=jnp.float32) * 0.1
    # to_out[1]: LayerNorm gain, init to ones as in the module.
    g = jnp.ones((dim, 1), dtype=jnp.float32)

    out = linear_attention_pallas(x, wqkv, wout, bout, g,
                                  heads=heads, dim_head=dim_head)
    out = jax.block_until_ready(out)

    ref = linear_attention_ref(x, wqkv, wout, bout, g,
                               heads=heads, dim_head=dim_head)
    ref = jax.block_until_ready(ref)

    assert out.shape == (B, dim, H, W)
    # Tolerance 5e-3: the EUP approximate reciprocals (~2^-12 rel.) and the
    # bf16 MXU operands (~2^-9 rel.) only perturb the small attention
    # contribution, which the channel LayerNorm keeps well inside this bound;
    # exp/accumulation/LayerNorm math remains f32.
    err = float(jnp.max(jnp.abs(out - ref)))
    assert jnp.allclose(out, ref, atol=5e-3, rtol=5e-3), err

    print("KERNEL_OK")
</pallas_src>

<mosaic_0001>
module attributes {stable_mosaic.version = 11 : i64} {
  func.func @_linear_attention_kernel(%arg0: i32, %arg1: memref<1x4x256xf32, #tpu.memory_space<vmem>>, %arg2: memref<4x384xf32, #tpu.memory_space<vmem>>, %arg3: memref<4x128xf32, #tpu.memory_space<vmem>>, %arg4: memref<4x1xf32, #tpu.memory_space<vmem>>, %arg5: memref<4x1xf32, #tpu.memory_space<vmem>>, %arg6: memref<128x128xf32, #tpu.memory_space<vmem>>, %arg7: memref<1x4x256xf32, #tpu.memory_space<vmem>>) attributes {dimension_semantics = [#tpu.dimension_semantics<parallel>], iteration_bounds = array<i64: 2>, scalar_prefetch = 0 : i64, scratch_operands = 0 : i64, tpu.core_type = #tpu.core_type<tc>, window_params = [{transform_indices = @transform_0, window_bounds = array<i64: 1, 4, 256>}, {pipeline_mode = #tpu.pipeline_mode<synchronous>, transform_indices = @transform_1, window_bounds = array<i64: 4, 384>}, {pipeline_mode = #tpu.pipeline_mode<synchronous>, transform_indices = @transform_2, window_bounds = array<i64: 4, 128>}, {pipeline_mode = #tpu.pipeline_mode<synchronous>, transform_indices = @transform_3, window_bounds = array<i64: 4, 1>}, {pipeline_mode = #tpu.pipeline_mode<synchronous>, transform_indices = @transform_4, window_bounds = array<i64: 4, 1>}, {pipeline_mode = #tpu.pipeline_mode<synchronous>, transform_indices = @transform_5, window_bounds = array<i64: 128, 128>}, {transform_indices = @transform_6, window_bounds = array<i64: 1, 4, 256>}]} {
    %c0 = arith.constant 0 : index
    %c0_0 = arith.constant 0 : index
    %0 = vector.load %arg2[%c0, %c0_0] : memref<4x384xf32, #tpu.memory_space<vmem>>, vector<4x384xf32>
    %c0_1 = arith.constant 0 : index
    %c0_2 = arith.constant 0 : index
    %1 = vector.load %arg3[%c0_1, %c0_2] : memref<4x128xf32, #tpu.memory_space<vmem>>, vector<4x128xf32>
    %c0_3 = arith.constant 0 : index
    %c0_4 = arith.constant 0 : index
    %2 = vector.load %arg6[%c0_3, %c0_4] : memref<128x128xf32, #tpu.memory_space<vmem>>, vector<128x128xf32>
    %c0_5 = arith.constant 0 : index
    %c0_6 = arith.constant 0 : index
    %3 = vector.load %arg4[%c0_5, %c0_6] : memref<4x1xf32, #tpu.memory_space<vmem>>, vector<4x1xf32>
    %4 = vector.shape_cast %3 : vector<4x1xf32> to vector<4x1xf32>
    %5 = vector.broadcast %4 : vector<4x1xf32> to vector<4x256xf32>
    %c0_7 = arith.constant 0 : index
    %c0_8 = arith.constant 0 : index
    %6 = vector.load %arg5[%c0_7, %c0_8] : memref<4x1xf32, #tpu.memory_space<vmem>>, vector<4x1xf32>
    %7 = vector.shape_cast %6 : vector<4x1xf32> to vector<4x1xf32>
    %8 = vector.broadcast %7 : vector<4x1xf32> to vector<4x256xf32>
    %9 = arith.truncf %1 : vector<4x128xf32> to vector<4x128xbf16>
    %c0_9 = arith.constant 0 : index
    %c0_10 = arith.constant 0 : index
    %c0_11 = arith.constant 0 : index
    %10 = vector.load %arg1[%c0_9, %c0_10, %c0_11] : memref<1x4x256xf32, #tpu.memory_space<vmem>>, vector<1x4x256xf32>
    %11 = vector.shape_cast %10 : vector<1x4x256xf32> to vector<4x256xf32>
    %cst = arith.constant dense<0.000000e+00> : vector<384x256xf32>
    %12 = tpu.matmul %0, %11, %cst {dimension_numbers = #tpu.dot_dimension_numbers<[0], [0], [1], [1], [0, 1, 1, 1], [], []>} : vector<4x384xf32>, vector<4x256xf32>, vector<384x256xf32> -> vector<384x256xf32>
    %13 = vector.extract_strided_slice %12 {offsets = [0, 0], sizes = [128, 256], strides = [1, 1]} : vector<384x256xf32> to vector<128x256xf32>
    %14 = vector.extract_strided_slice %12 {offsets = [128, 0], sizes = [128, 256], strides = [1, 1]} : vector<384x256xf32> to vector<128x256xf32>
    %15 = vector.extract_strided_slice %12 {offsets = [256, 0], sizes = [128, 256], strides = [1, 1]} : vector<384x256xf32> to vector<128x256xf32>
    %16 = vector.shape_cast %13 : vector<128x256xf32> to vector<4x32x256xf32>
    %cst_12 = arith.constant dense<0xFF800000> : vector<4x256xf32>
    %17 = vector.multi_reduction <maximumf>, %16, %cst_12 [1] : vector<4x32x256xf32> to vector<4x256xf32>
    %18 = vector.shape_cast %17 : vector<4x256xf32> to vector<4x1x256xf32>
    %19 = vector.broadcast %18 : vector<4x1x256xf32> to vector<4x32x256xf32>
    %20 = arith.subf %16, %19 : vector<4x32x256xf32>
    %21 = math.exp %20 : vector<4x32x256xf32>
    %cst_13 = arith.constant dense<0.000000e+00> : vector<4x256xf32>
    %22 = vector.multi_reduction <add>, %21, %cst_13 [1] : vector<4x32x256xf32> to vector<4x256xf32>
    %23 = vector.shape_cast %22 : vector<4x256xf32> to vector<4x1x256xf32>
    %24 = tpu.reciprocal %23 {approx = true} : vector<4x1x256xf32> -> vector<4x1x256xf32>
    %25 = vector.broadcast %24 : vector<4x1x256xf32> to vector<4x32x256xf32>
    %26 = arith.mulf %21, %25 : vector<4x32x256xf32>
    %27 = vector.shape_cast %26 : vector<4x32x256xf32> to vector<128x256xf32>
    %cst_14 = arith.constant dense<0xFF800000> : vector<128xf32>
    %28 = vector.multi_reduction <maximumf>, %14, %cst_14 [1] : vector<128x256xf32> to vector<128xf32>
    %29 = vector.shape_cast %28 : vector<128xf32> to vector<128x1xf32>
    %30 = vector.broadcast %29 : vector<128x1xf32> to vector<128x256xf32>
    %31 = arith.subf %14, %30 : vector<128x256xf32>
    %32 = math.exp %31 : vector<128x256xf32>
    %cst_15 = arith.constant dense<0.000000e+00> : vector<128xf32>
    %33 = vector.multi_reduction <add>, %32, %cst_15 [1] : vector<128x256xf32> to vector<128xf32>
    %34 = vector.shape_cast %33 : vector<128xf32> to vector<128x1xf32>
    %35 = tpu.reciprocal %34 {approx = true} : vector<128x1xf32> -> vector<128x1xf32>
    %36 = vector.broadcast %35 : vector<128x1xf32> to vector<128x256xf32>
    %37 = arith.mulf %32, %36 : vector<128x256xf32>
    %38 = arith.truncf %15 : vector<128x256xf32> to vector<128x256xbf16>
    %39 = arith.truncf %37 : vector<128x256xf32> to vector<128x256xbf16>
    %cst_16 = arith.constant dense<0.000000e+00> : vector<128x128xf32>
    %40 = tpu.matmul %38, %39, %cst_16 {dimension_numbers = #tpu.dot_dimension_numbers<[1], [1], [0], [0], [0, 0, 1, 0], [], []>} : vector<128x256xbf16>, vector<128x256xbf16>, vector<128x128xf32> -> vector<128x128xf32>
    %41 = arith.mulf %40, %2 : vector<128x128xf32>
    %42 = arith.truncf %41 : vector<128x128xf32> to vector<128x128xbf16>
    %43 = arith.truncf %27 : vector<128x256xf32> to vector<128x256xbf16>
    %cst_17 = arith.constant dense<0.000000e+00> : vector<128x256xf32>
    %44 = tpu.matmul %42, %43, %cst_17 {dimension_numbers = #tpu.dot_dimension_numbers<[1], [0], [0], [1], [0, 0, 1, 1], [], []>} : vector<128x128xbf16>, vector<128x256xbf16>, vector<128x256xf32> -> vector<128x256xf32>
    %45 = arith.truncf %44 : vector<128x256xf32> to vector<128x256xbf16>
    %cst_18 = arith.constant dense<0.000000e+00> : vector<4x256xf32>
    %46 = tpu.matmul %9, %45, %cst_18 {dimension_numbers = #tpu.dot_dimension_numbers<[1], [0], [0], [1], [0, 0, 1, 1], [], []>} : vector<4x128xbf16>, vector<128x256xbf16>, vector<4x256xf32> -> vector<4x256xf32>
    %47 = arith.addf %46, %5 : vector<4x256xf32>
    %cst_19 = arith.constant dense<0.000000e+00> : vector<256xf32>
    %48 = vector.multi_reduction <add>, %47, %cst_19 [0] : vector<4x256xf32> to vector<256xf32>
    %49 = vector.shape_cast %48 : vector<256xf32> to vector<1x256xf32>
    %cst_20 = arith.constant 4.000000e+00 : f32
    %50 = vector.broadcast %cst_20 : f32 to vector<1x256xf32>
    %51 = arith.divf %49, %50 : vector<1x256xf32>
    %52 = vector.broadcast %51 : vector<1x256xf32> to vector<4x256xf32>
    %53 = arith.subf %47, %52 : vector<4x256xf32>
    %54 = arith.mulf %53, %53 : vector<4x256xf32>
    %cst_21 = arith.constant dense<0.000000e+00> : vector<256xf32>
    %55 = vector.multi_reduction <add>, %54, %cst_21 [0] : vector<4x256xf32> to vector<256xf32>
    %56 = vector.shape_cast %55 : vector<256xf32> to vector<1x256xf32>
    %cst_22 = arith.constant 4.000000e+00 : f32
    %57 = vector.broadcast %cst_22 : f32 to vector<1x256xf32>
    %58 = arith.divf %56, %57 : vector<1x256xf32>
    %59 = vector.broadcast %51 : vector<1x256xf32> to vector<4x256xf32>
    %60 = arith.subf %47, %59 : vector<4x256xf32>
    %cst_23 = arith.constant 9.99999974E-6 : f32
    %61 = vector.broadcast %cst_23 : f32 to vector<1x256xf32>
    %62 = arith.addf %58, %61 : vector<1x256xf32>
    %63 = math.rsqrt %62 : vector<1x256xf32>
    %64 = vector.broadcast %63 : vector<1x256xf32> to vector<4x256xf32>
    %65 = arith.mulf %60, %64 : vector<4x256xf32>
    %66 = arith.mulf %65, %8 : vector<4x256xf32>
    %c0_24 = arith.constant 0 : index
    %c0_25 = arith.constant 0 : index
    %c0_26 = arith.constant 0 : index
    %67 = vector.load %arg7[%c0_24, %c0_25, %c0_26] : memref<1x4x256xf32, #tpu.memory_space<vmem>>, vector<1x4x256xf32>
    %68 = vector.shape_cast %67 : vector<1x4x256xf32> to vector<4x256xf32>
    %69 = vector.shape_cast %66 : vector<4x256xf32> to vector<1x4x256xf32>
    tpu.vector_store %arg7[%c0_24, %c0_25, %c0_26], %69 {strides = array<i32>} : memref<1x4x256xf32, #tpu.memory_space<vmem>>, vector<1x4x256xf32>,
    return
  }
  func.func @transform_0(%arg0: i32) -> (i32, i32, i32) {
    %c0_i32 = arith.constant 0 : i32
    %c0_i32_0 = arith.constant 0 : i32
    %c0_i32_1 = arith.constant 0 : i32
    return %arg0, %c0_i32, %c0_i32_0 : i32, i32, i32
  }
  func.func @transform_1(%arg0: i32) -> (i32, i32) {
    %c0_i32 = arith.constant 0 : i32
    %c0_i32_0 = arith.constant 0 : i32
    %c0_i32_1 = arith.constant 0 : i32
    return %c0_i32, %c0_i32_0 : i32, i32
  }
  func.func @transform_2(%arg0: i32) -> (i32, i32) {
    %c0_i32 = arith.constant 0 : i32
    %c0_i32_0 = arith.constant 0 : i32
    %c0_i32_1 = arith.constant 0 : i32
    return %c0_i32, %c0_i32_0 : i32, i32
  }
  func.func @transform_3(%arg0: i32) -> (i32, i32) {
    %c0_i32 = arith.constant 0 : i32
    %c0_i32_0 = arith.constant 0 : i32
    %c0_i32_1 = arith.constant 0 : i32
    return %c0_i32, %c0_i32_0 : i32, i32
  }
  func.func @transform_4(%arg0: i32) -> (i32, i32) {
    %c0_i32 = arith.constant 0 : i32
    %c0_i32_0 = arith.constant 0 : i32
    %c0_i32_1 = arith.constant 0 : i32
    return %c0_i32, %c0_i32_0 : i32, i32
  }
  func.func @transform_5(%arg0: i32) -> (i32, i32) {
    %c0_i32 = arith.constant 0 : i32
    %c0_i32_0 = arith.constant 0 : i32
    %c0_i32_1 = arith.constant 0 : i32
    return %c0_i32, %c0_i32_0 : i32, i32
  }
  func.func @transform_6(%arg0: i32) -> (i32, i32, i32) {
    %c0_i32 = arith.constant 0 : i32
    %c0_i32_0 = arith.constant 0 : i32
    %c0_i32_1 = arith.constant 0 : i32
    return %arg0, %c0_i32, %c0_i32_0 : i32, i32, i32
  }
}

</mosaic_0001>

<bundles_post_ra>
// kernel: tpu_custom_call.1
= control target key start
LH: loop header
LB: loop body
LE: loop exit
PB: predicated region body
PF: predicated region fallthrough
CT: control target
= control target key end

     0   :  { %11 = vsyncpa [#allocation3], 0  ;;  %s3517_s0 = inlined_call_operand.hbm [shape: f32[2,4,256], index: 0, kind: input, shape index: {}]   ;;  %s3518_s1 = inlined_call_operand.vmem [shape: f32[4,384], index: 1, kind: input, shape index: {}]   ;;  %s3519_s2 = inlined_call_operand.vmem [shape: f32[4,128], index: 2, kind: input, shape index: {}]   ;;  %s3520_s3 = inlined_call_operand.vmem [shape: f32[4,1], index: 3, kind: input, shape index: {}]   ;;  %s3521_s4 = inlined_call_operand.vmem [shape: f32[4,1], index: 4, kind: input, shape index: {}]   ;;  %s3522_s5 = inlined_call_operand.hbm [shape: f32[128,128], index: 5, kind: input, shape index: {}]   ;;  %s3523_s6 = inlined_call_operand.hbm [shape: f32[2,4,256], index: 6, kind: output, shape index: {}]  }
   0x1   :  { %13 = vsyncpa [#allocation3 + $0x1], 0 }
   0x2   :  { %14 = vsyncpa [#allocation6], 0 }
   0x3   :  { %15 = vsyncpa [#allocation4], 0 }
   0x4   :  { %17 = vsyncpa [#allocation4 + $0x1], 0  ;;  %s2410_s21 = smov 0   ;;  %s2412_s22 = smov 0  }
   0x5   :  { %s2414_s23 = smov 0   ;;  %s2416_s24 = smov 0  }
   0x6 LB: > { %s2431_s25 = sadd.s32 4294967295, %s2366_s24   ;;  %s1925_s26 = sadd.s32 4294967294, %s2366_s24   ;;  %s2366_s24 = sphi %s2416_s24, %s3706_s24   ;;  %s2362_s23 = sphi %s2414_s23, %s3705_s23   ;;  %s2358_s22 = sphi %s2412_s22, %s3704_s22   ;;  %s2354_s21 = sphi %s2410_s21, %s3703_s21  }
   0x7   : > { %p43_p0 = scmp.ne.s32.totalorder %s2358_s22, %s2354_s21  ;;  %p3524_p1 = scmp.eq.s32.totalorder %s2431_s25, 0 }
   0x8   : > { %p178_p3 = scmp.eq.s32.totalorder %s1925_s26, 1  ;;  %p1926_p5 = scmp.ge.s32.totalorder %s2366_s24, 1 }
   0x9   : > { %p2440_p4 = por %p3524_p1, %p43_p0  ;;  %p185_p7 = scmp.lt.s32.totalorder %s2366_s24, 3 }
   0xa   : > { %p2445_p6 = por %p178_p3, %p43_p0  ;;  %s2368_s30 = smov [#allocation5]  }
   0xb   : > { %s3571_s27 = scalar_select %p2440_p4, 1, 0 }
   0xc   : > { %s3572_s28 = scalar_select %p2445_p6, 1, 0 }
   0xd   : > { %p2450_p8 = pnand %p1926_p5, %p185_p7  ;;  %s209_s7 = sshll.u32 %s2368_s30, 4  ;;  %s2454_s7 = int_to_ptr.vmem [resolvable:$true] %s209_s7 }
   0xe   : > { %s2466_s9 = sadd.s32 1, %s2366_s24   ;;  %s30_s10 = sadd.s32 1, %s2362_s23 }
   0xf   : > { %s3573_s29 = scalar_select %p2450_p8, 1, 0 }
  0x10   : > { %p2001_p9 = pneg %p2450_p8  ;;  %s27_s11 = ssub.s32 %s2366_s24, %s2466_s9 }
  0x11   : > { %s2238_s14 = scalar_lea.hbm %s3522_s5, 2048 }
  0x12   : > { %p2461_p11 = pnand %p2001_p9, %p3524_p1  ;;  %p2239_p12 = scmp.ne.s32.totalorder %s3522_s5, %s2238_s14 }
  0x13   : > { %p2245_p5 = scmp.lt.u32.totalorder %s2238_s14, %s3522_s5 }
  0x14   : > { %p2240_p13 = pneg %p2461_p11 }
  0x16   : > { %p2241_p0 = pnand %p2240_p13, %p2239_p12 }
  0x18   : > { %p2242_p3 = pneg %p2241_p0 }
  0x1a   : > { %p2247_p7 = pnand %p2245_p5, %p2242_p3 }
  0x1c   : > { %2250 = shalt.err (!%p2247_p7)
}
  0x1d   : > { %s2251_s19 = scalar_lea.vmem %s2454_s7, 2048  ;;  %p2259_p2 = scmp.lt.s32.totalorder %s2454_s7, %s2454_s7 }
  0x1e   : > { %p2252_p9 = scmp.ne.s32.totalorder %s2454_s7, %s2251_s19  ;;  %p2260_p6 = scmp.lt.s32.totalorder %s2251_s19, %s2251_s19 }
  0x20   : > { %p2254_p10 = pnand %p2252_p9, %p2240_p13  ;;  %p2261_p4 = por %p2260_p6, %p2259_p2 }
  0x22   : > { %p2255_p1 = pneg %p2254_p10 }
  0x24   : > { %p2262_p8 = pnand %p2261_p4, %p2255_p1 }
  0x26   : > { %2265 = shalt.err (!%p2262_p8)
}
  0x27   : > { %s2369_s20 = smov 128   ;;  %s2370_s26 = smov 8  }
  0x28   : > { %2004 = dma.hbm_to_vmem [thread:$0]  (!%p2461_p11), %s3522_s5, 2048, %s2454_s7, [#allocation6], %s2369_s20, %s2369_s20, %s2370_s26  }
  0x29   : > { %p28_p2 = scmp.eq.s32.totalorder %s27_s11, 0  ;;  %p37_p1 = scmp.ne.s32.totalorder %s2362_s23, %s2358_s22 }
  0x2a   : > { %p38_p4 = scmp.eq.s32.totalorder %s2366_s24, 0  ;;  %p2014_p6 = scmp.lt.s32.totalorder %s2366_s24, 2 }
  0x2b   : > { %s2497_s13 = scalar_select %p28_p2, %s2362_s23, %s30_s10  }
  0x2c   : > { %p39_p8 = por %p38_p4, %p37_p1  ;;  %p3575_p10 = scmp.eq.s32.totalorder %s2431_s25, 1 }
  0x2d   : > { %s223_s15 = sand.u32 1, %s2362_s23   ;;  %s1991_s16 = sshll.u32 %s2366_s24, 7 }
  0x2e   : > { %p2501_p12 = por %p3575_p10, %p37_p1  ;;  %s1929_s17 = sshll.u32 %s223_s15, 3 }
  0x2f   : > { %s2510_s19 = scalar_lea.hbm %s3517_s0, %s1991_s16  ;;  %s227_s7 = scalar_lea.vmem [#allocation2], %s1929_s17 }
  0x30   : > { %s235_s10 = sshll.u32 %s227_s7, 4  ;;  %p2512_p11 = pnand %p2014_p6, %p39_p8  ;;  %s2516_s10 = int_to_ptr.vmem [resolvable:$true] %s235_s10 }
  0x31   : > { %s224_s20 = scalar_lea.sflag [#allocation3], %s223_s15  ;;  %s2266_s26 = scalar_lea.hbm %s2510_s19, 128 }
  0x32   : > { %p2267_p13 = scmp.ne.s32.totalorder %s2510_s19, %s2266_s26  ;;  %p2268_p0 = pneg %p2512_p11 }
  0x33   : > { %s2271_s16 = scalar_lea.hbm %s3517_s0, 256  ;;  %p2272_p7 = scmp.lt.u32.totalorder %s2510_s19, %s3517_s0 }
  0x34   : > { %p2269_p3 = pnand %p2268_p0, %p2267_p13  ;;  %p2273_p9 = scmp.lt.u32.totalorder %s2271_s16, %s2266_s26 }
  0x35   : > { %p2275_p1 = scmp.lt.u32.totalorder %s2266_s26, %s2510_s19 }
  0x36   : > { %p2270_p5 = pneg %p2269_p3  ;;  %p2274_p2 = por %p2273_p9, %p2272_p7 }
  0x38   : > { %p2276_p4 = por %p2275_p1, %p2274_p2 }
  0x3a   : > { %p2277_p6 = pnand %p2276_p4, %p2270_p5 }
  0x3c   : > { %2280 = shalt.err (!%p2277_p6)
}
  0x3d   : > { %s2281_s15 = scalar_lea.vmem %s2516_s10, 128  ;;  %s2371_s18 = smov [#allocation2]  }
  0x3e   : > { %p2282_p8 = scmp.ne.s32.totalorder %s2516_s10, %s2281_s15  ;;  %s2286_s7 = sshll.u32 %s2371_s18, 4  ;;  %s2287_s7 = int_to_ptr.vmem [resolvable:$false] %s2286_s7 }
  0x3f   : > { %s2288_s30 = scalar_lea.vmem %s2287_s7, 256  ;;  %p2289_p3 = scmp.lt.s32.totalorder %s2516_s10, %s2287_s7 }
  0x40   : > { %p2284_p10 = pnand %p2282_p8, %p2268_p0  ;;  %p2290_p7 = scmp.lt.s32.totalorder %s2288_s30, %s2281_s15 }
  0x42   : > { %p2285_p13 = pneg %p2284_p10  ;;  %p2291_p9 = por %p2290_p7, %p2289_p3 }
  0x44   : > { %p2292_p2 = pnand %p2291_p9, %p2285_p13 }
  0x46   : > { %2295 = shalt.err (!%p2292_p2)
}
  0x47   : > { %2008 = dma.hbm_to_vmem [thread:$0]  (!%p2512_p11), %s2510_s19, 128, %s2516_s10, %s224_s20  }
  0x48   : > { %p3578_p5 = scmp.ne.s32.totalorder %s3573_s29, 0 }
  0x4a   : > { %244 = sbr.rel (%p3578_p5) target bundleno = 1663 (0x67f), region = 44 }
  0x51   : > { %s2546_s26 = sand.u32 1, %s2358_s22   ;;  %p3579_p0 = scmp.ne.s32.totalorder %s3571_s27, 0 }
  0x52   : > { %s1933_s12 = sshll.u32 %s2546_s26, 3  ;;  %s247_s16 = scalar_lea.sflag [#allocation3], %s2546_s26 }
  0x53   : > { %s250_s17 = scalar_lea.vmem [#allocation2], %s1933_s12 }
  0x54   : > { %2341 = dma.done.wait (%p3579_p0), %s247_s16, 128  }
  0x55   : > { %2343 = vsyncadd (%p3579_p0), %s247_s16, 4294967168  ;;  %p3580_p11 = scmp.eq.s32.totalorder %s2431_s25, 0 }
  0x57   : > { %2345 = dma.done.wait (%p3580_p11), [#allocation6], 2048   ;;  %p3581_p1 = pmov %p3580_p11 }
  0x58   : > { %v2372_v0 = vmov 0.0   ;;  %v284_v1 = vld [vmem:[%s3518_s1] sm:$0xff]  ;;  %vm563_vm0 = vcmask 1043456   ;;  %v285_v5 = vld [vmem:[%s3518_s1 + $0x8] sm:$0xf]  ;;  %vm418_vm1 = vcmask 31744  }
  0x59   : > { %2347 = vsyncadd (%p3581_p1), [#allocation6], 4294965248  ;;  %632 = vmatprep.mubr.f32.mxu0 %v2372_v0  ;;  %v316_v2 = vld [vmem:[%s250_s17] sm:$0xff]  ;;  %320 = vxpose.xlu0.b32.start.end [1/1] (short) %v284_v1, 128  ;;  %v318_v4 = vcombine.high %v284_v1, %v284_v1  ;;  %s1992_s30 = sshll.u32 %s2431_s25, 7  ;;  %s282_s16 = scalar_lea.vmem [#allocation7], %s1933_s12 }
  0x5a   : > { %v417_v3 = vcombine.high %v316_v2, %v316_v2  ;;  %384 = vxpose.xlu1.b32.start.end [1/1] (short) %v285_v5, 128  ;;  %s1845_s17 = sshll.u32 %s282_s16, 4  ;;  %s3473_s27 = scalar_lea.hbm %s3523_s6, %s1992_s30  ;;  %s3475_s17 = int_to_ptr.vmem [resolvable:$true] %s1845_s17 }
  0x5b   : > { %s1831_s10 = scalar_lea.sflag [#allocation4], %s2546_s26  ;;  %s2296_s11 = scalar_lea.vmem %s3475_s17, 128 }
  0x5c   : > { %1936 = vmatprep.subr.msk.mxu0 %vm563_vm0, %v417_v3  ;;  %p2297_p4 = scmp.ne.s32.totalorder %s3475_s17, %s2296_s11  ;;  %s2374_s25 = smov [#allocation7]  }
  0x5d   : > { %1937 = vmatpush1.msk.msra.mxu0 %vm563_vm0, %v316_v2  ;;  %s2300_s12 = sshll.u32 %s2374_s25, 4  ;;  %s2301_s12 = int_to_ptr.vmem [resolvable:$false] %s2300_s12 }
  0x5e   : > { %p2298_p6 = pnand %p2297_p4, %p2501_p12  ;;  %s2302_s20 = scalar_lea.vmem %s2301_s12, 256 }
  0x5f   : > { %p2303_p10 = scmp.lt.s32.totalorder %s3475_s17, %s2301_s12  ;;  %p2304_p13 = scmp.lt.s32.totalorder %s2302_s20, %s2296_s11 }
  0x60   : > { %p2299_p8 = pneg %p2298_p6 }
  0x61   : > { %p2305_p3 = por %p2304_p13, %p2303_p10 }
  0x63   : > { %p2306_p7 = pnand %p2305_p3, %p2299_p8 }
  0x96   : > { %352 = vxpose.xlu0.b32.start.end [1/1] (short) %v318_v4, 128 }
  0xd9   : > { %v336_v6 = vpop.trf.xlu0 }
  0xda   : > { %1938 = vmatmul.mubr.msk.f32.vlgmr.msra.gmra.mrb[0].mxu0 %vm418_vm1, %v336_v6  ;;  %v400_v43 = vpop.trf.xlu1 }
  0xdb   : > { %638 = vmatprep.mubr.f32.mxu0 %v2372_v0 }
  0xdd   : > { %v337_v7 = vpop.trf.xlu0 }
  0xde   : > { %1939 = vmatmul.mubr.msk.f32.gmra.mrb[2].mxu0 %vm418_vm1, %v337_v7  ;;  %v401_v48 = vpop.trf.xlu1 }
  0xdf   : > { %644 = vmatprep.mubr.f32.mxu0 %v2372_v0 }
  0xe1   : > { %v338_v8 = vpop.trf.xlu0 }
  0xe2   : > { %1940 = vmatmul.mubr.msk.f32.gmra.mrb[4].mxu0 %vm418_vm1, %v338_v8  ;;  %v402_v53 = vpop.trf.xlu1 }
  0xe3   : > { %650 = vmatprep.mubr.f32.mxu0 %v2372_v0 }
  0xe5   : > { %v339_v9 = vpop.trf.xlu0 }
  0xe6   : > { %1941 = vmatmul.mubr.msk.f32.gmra.mrb[6].mxu0 %vm418_vm1, %v339_v9  ;;  %v403_v60 = vpop.trf.xlu1 }
  0xe7   : > { %656 = vmatprep.mubr.f32.mxu0 %v2372_v0 }
  0xe9   : > { %v340_v10 = vpop.trf.xlu0 }
  0xea   : > { %1942 = vmatmul.mubr.msk.f32.gmra.mrb[8].mxu0 %vm418_vm1, %v340_v10  ;;  %v404_v5 = vpop.trf.xlu1 }
  0xeb   : > { %662 = vmatprep.mubr.f32.mxu0 %v2372_v0 }
  0xed   : > { %v341_v11 = vpop.trf.xlu0 }
  0xee   : > { %1943 = vmatmul.mubr.msk.f32.gmra.mrb[10].mxu0 %vm418_vm1, %v341_v11 }
  0xef   : > { %668 = vmatprep.mubr.f32.mxu0 %v2372_v0 }
  0xf1   : > { %v342_v12 = vpop.trf.xlu0 }
  0xf2   : > { %1944 = vmatmul.mubr.msk.f32.gmra.mrb[12].mxu0 %vm418_vm1, %v342_v12 }
  0xf3   : > { %674 = vmatprep.mubr.f32.mxu0 %v2372_v0 }
  0xf5   : > { %v343_v13 = vpop.trf.xlu0 }
  0xf6   : > { %1945 = vmatmul.mubr.msk.f32.gmra.mrb[14].mxu0 %vm418_vm1, %v343_v13 }
  0xf7   : > { %680 = vmatprep.mubr.f32.mxu0 %v2372_v0 }
  0xf9   : > { %v344_v14 = vpop.trf.xlu0 }
  0xfa   : > { %1946 = vmatmul.mubr.msk.f32.gmra.mrb[16].mxu0 %vm418_vm1, %v344_v14  ;;  %v405_v14 = vpop.trf.xlu1 }
  0xfb   : > { %686 = vmatprep.mubr.f32.mxu0 %v2372_v0 }
  0xfd   : > { %v345_v15 = vpop.trf.xlu0 }
  0xfe   : > { %1947 = vmatmul.mubr.msk.f32.gmra.mrb[18].mxu0 %vm418_vm1, %v345_v15 }
  0xff   : > { %692 = vmatprep.mubr.f32.mxu0 %v2372_v0 }
 0x101   : > { %v346_v16 = vpop.trf.xlu0 }
 0x102   : > { %1948 = vmatmul.mubr.msk.f32.gmra.mrb[20].mxu0 %vm418_vm1, %v346_v16 }
 0x103   : > { %698 = vmatprep.mubr.f32.mxu0 %v2372_v0 }
 0x105   : > { %v347_v17 = vpop.trf.xlu0 }
 0x106   : > { %1949 = vmatmul.mubr.msk.f32.gmra.mrb[22].mxu0 %vm418_vm1, %v347_v17 }
 0x107   : > { %704 = vmatprep.mubr.f32.mxu0 %v2372_v0 }
 0x109   : > { %v348_v18 = vpop.trf.xlu0 }
 0x10a   : > { %1950 = vmatmul.mubr.msk.f32.gmra.mrb[24].mxu0 %vm418_vm1, %v348_v18 }
 0x10b   : > { %710 = vmatprep.mubr.f32.mxu0 %v2372_v0 }
 0x10d   : > { %v349_v19 = vpop.trf.xlu0 }
 0x10e   : > { %1951 = vmatmul.mubr.msk.f32.gmra.mrb[26].mxu0 %vm418_vm1, %v349_v19 }
 0x10f   : > { %716 = vmatprep.mubr.f32.mxu0 %v2372_v0 }
 0x111   : > { %v350_v20 = vpop.trf.xlu0 }
 0x112   : > { %1952 = vmatmul.mubr.msk.f32.gmra.mrb[28].mxu0 %vm418_vm1, %v350_v20 }
 0x113   : > { %722 = vmatprep.mubr.f32.mxu0 %v2372_v0 }
 0x115   : > { %v351_v21 = vpop.trf.xlu0 }
 0x116   : > { %1953 = vmatmul.mubr.msk.f32.gmra.mrb[30].mxu0 %vm418_vm1, %v351_v21 }
 0x117   : > { %728 = vmatprep.mubr.f32.mxu0 %v2372_v0 }
 0x119   : > { %v368_v22 = vpop.trf.xlu0 }
 0x11a   : > { %1954 = vmatmul.mubr.msk.f32.gmra.mrb[32].mxu0 %vm418_vm1, %v368_v22 }
 0x11b   : > { %734 = vmatprep.mubr.f32.mxu0 %v2372_v0 }
 0x11d   : > { %v369_v23 = vpop.trf.xlu0 }
 0x11e   : > { %1955 = vmatmul.mubr.msk.f32.gmra.mrb[34].mxu0 %vm418_vm1, %v369_v23 }
 0x11f   : > { %740 = vmatprep.mubr.f32.mxu0 %v2372_v0 }
 0x121   : > { %v370_v24 = vpop.trf.xlu0 }
 0x122   : > { %1956 = vmatmul.mubr.msk.f32.gmra.mrb[36].mxu0 %vm418_vm1, %v370_v24 }
 0x123   : > { %746 = vmatprep.mubr.f32.mxu0 %v2372_v0 }
 0x125   : > { %v371_v25 = vpop.trf.xlu0 }
 0x126   : > { %1957 = vmatmul.mubr.msk.f32.gmra.mrb[38].mxu0 %vm418_vm1, %v371_v25 }
 0x127   : > { %752 = vmatprep.mubr.f32.mxu0 %v2372_v0 }
 0x129   : > { %v372_v26 = vpop.trf.xlu0 }
 0x12a   : > { %1958 = vmatmul.mubr.msk.f32.gmra.mrb[40].mxu0 %vm418_vm1, %v372_v26 }
 0x12b   : > { %758 = vmatprep.mubr.f32.mxu0 %v2372_v0 }
 0x12d   : > { %v373_v27 = vpop.trf.xlu0 }
 0x12e   : > { %1959 = vmatmul.mubr.msk.f32.gmra.mrb[42].mxu0 %vm418_vm1, %v373_v27 }
 0x12f   : > { %764 = vmatprep.mubr.f32.mxu0 %v2372_v0 }
 0x131   : > { %v374_v28 = vpop.trf.xlu0 }
 0x132   : > { %1960 = vmatmul.mubr.msk.f32.gmra.mrb[44].mxu0 %vm418_vm1, %v374_v28 }
 0x133   : > { %770 = vmatprep.mubr.f32.mxu0 %v2372_v0 }
 0x135   : > { %v375_v29 = vpop.trf.xlu0 }
 0x136   : > { %1961 = vmatmul.mubr.msk.f32.gmra.mrb[46].mxu0 %vm418_vm1, %v375_v29 }
 0x137   : > { %776 = vmatprep.mubr.f32.mxu0 %v2372_v0 }
 0x139   : > { %v376_v30 = vpop.trf.xlu0 }
 0x13a   : > { %1962 = vmatmul.mubr.msk.f32.gmra.mrb[48].mxu0 %vm418_vm1, %v376_v30  ;;  %v406_v30 = vpop.trf.xlu1 }
 0x13b   : > { %782 = vmatprep.mubr.f32.mxu0 %v2372_v0 }
 0x13d   : > { %v377_v31 = vpop.trf.xlu0 }
 0x13e   : > { %1963 = vmatmul.mubr.msk.f32.gmra.mrb[50].mxu0 %vm418_vm1, %v377_v31 }
 0x13f   : > { %788 = vmatprep.mubr.f32.mxu0 %v2372_v0 }
 0x141   : > { %v378_v32 = vpop.trf.xlu0 }
 0x142   : > { %1964 = vmatmul.mubr.msk.f32.gmra.mrb[52].mxu0 %vm418_vm1, %v378_v32 }
 0x143   : > { %794 = vmatprep.mubr.f32.mxu0 %v2372_v0 }
 0x145   : > { %v379_v33 = vpop.trf.xlu0 }
 0x146   : > { %1965 = vmatmul.mubr.msk.f32.gmra.mrb[54].mxu0 %vm418_vm1, %v379_v33 }
 0x147   : > { %800 = vmatprep.mubr.f32.mxu0 %v2372_v0 }
 0x149   : > { %v380_v34 = vpop.trf.xlu0 }
 0x14a   : > { %1966 = vmatmul.mubr.msk.f32.gmra.mrb[56].mxu0 %vm418_vm1, %v380_v34 }
 0x14b   : > { %806 = vmatprep.mubr.f32.mxu0 %v2372_v0 }
 0x14d   : > { %v381_v35 = vpop.trf.xlu0 }
 0x14e   : > { %1967 = vmatmul.mubr.msk.f32.gmra.mrb[58].mxu0 %vm418_vm1, %v381_v35 }
 0x14f   : > { %812 = vmatprep.mubr.f32.mxu0 %v2372_v0 }
 0x151   : > { %v382_v36 = vpop.trf.xlu0 }
 0x152   : > { %1968 = vmatmul.mubr.msk.f32.gmra.mrb[60].mxu0 %vm418_vm1, %v382_v36 }
 0x153   : > { %818 = vmatprep.mubr.f32.mxu0 %v2372_v0 }
 0x155   : > { %v383_v37 = vpop.trf.xlu0 }
 0x156   : > { %1969 = vmatmul.mubr.msk.f32.gmra.mrb[62].mxu0 %vm418_vm1, %v383_v37 }
 0x157   : > { %824 = vmatprep.mubr.f32.mxu0 %v2372_v0 }
 0x15a   : > { %1970 = vmatmul.mubr.msk.f32.gmra.mrb[64].mxu0 %vm418_vm1, %v400_v43 }
 0x15b   : > { %830 = vmatprep.mubr.f32.mxu0 %v2372_v0 }
 0x15e   : > { %1971 = vmatmul.mubr.msk.f32.gmra.mrb[66].mxu0 %vm418_vm1, %v401_v48 }
 0x15f   : > { %836 = vmatprep.mubr.f32.mxu0 %v2372_v0 }
 0x162   : > { %1972 = vmatmul.mubr.msk.f32.gmra.mrb[68].mxu0 %vm418_vm1, %v402_v53 }
 0x163   : > { %842 = vmatprep.mubr.f32.mxu0 %v2372_v0 }
 0x166   : > { %1973 = vmatmul.mubr.msk.f32.gmra.mrb[70].mxu0 %vm418_vm1, %v403_v60 }
 0x167   : > { %848 = vmatprep.mubr.f32.mxu0 %v2372_v0 }
 0x16a   : > { %1974 = vmatmul.mubr.msk.f32.gmra.mrb[72].mxu0 %vm418_vm1, %v404_v5 }
 0x16b   : > { %854 = vmatprep.mubr.f32.mxu0 %v2372_v0 }
 0x16e   : > { %1975 = vmatmul.mubr.msk.f32.gmra.mrb[74].mxu0 %vm418_vm1, %v405_v14 }
 0x16f   : > { %860 = vmatprep.mubr.f32.mxu0 %v2372_v0 }
 0x172   : > { %1976 = vmatmul.mubr.msk.f32.gmra.mrb[76].mxu0 %vm418_vm1, %v406_v30 }
 0x173   : > { %866 = vmatprep.mubr.f32.mxu0 %v2372_v0 }
 0x1ad   : > { %v2633_v38 = vpop.f32.mrb[0].mxu0 }
 0x1ae   : > { %v2635_v39 = vpop.f32.mrb[1].mxu0 }
 0x1b1   : > { %v640_v40 = vpop.f32.mrb[2].mxu0 }
 0x1b2   : > { %v921_v41 = vmax.f32 %v2633_v38, %v640_v40  ;;  %v2638_v42 = vpop.f32.mrb[3].mxu0 }
 0x1b3   : > { %v930_v44 = vmax.f32 %v2635_v39, %v2638_v42 }
 0x1b5   : > { %v646_v45 = vpop.f32.mrb[4].mxu0 }
 0x1b6   : > { %v922_v46 = vmax.f32 %v921_v41, %v646_v45  ;;  %v2644_v47 = vpop.f32.mrb[5].mxu0 }
 0x1b7   : > { %v931_v49 = vmax.f32 %v930_v44, %v2644_v47 }
 0x1b9   : > { %v652_v50 = vpop.f32.mrb[6].mxu0 }
 0x1ba   : > { %v923_v51 = vmax.f32 %v922_v46, %v652_v50  ;;  %v2649_v52 = vpop.f32.mrb[7].mxu0 }
 0x1bb   : > { %v932_v54 = vmax.f32 %v931_v49, %v2649_v52 }
 0x1bc   : > { %v924_v55 = vrot.slane %v923_v51, 4 }
 0x1bd   : > { %v933_v56 = vrot.slane %v932_v54, 4  ;;  %v2654_v57 = vpop.f32.mrb[8].mxu0 }
 0x1be   : > { %v925_v58 = vmax.f32 %v923_v51, %v924_v55  ;;  %v2656_v59 = vpop.f32.mrb[9].mxu0 }
 0x1bf   : > { %v934_v61 = vmax.f32 %v932_v54, %v933_v56 }
 0x1c0   : > { %v926_v62 = vrot.slane %v925_v58, 2 }
 0x1c1   : > { %v935_v63 = vrot.slane %v934_v61, 2  ;;  %v2660_v1 = vpop.f32.mrb[10].mxu0 }
 0x1c2   : > { %v927_v2 = vmax.f32 %v925_v58, %v926_v62  ;;  %v939_v3 = vmax.f32 %v2654_v57, %v2660_v1  ;;  %v2664_v4 = vpop.f32.mrb[11].mxu0 }
 0x1c3   : > { %v936_v6 = vmax.f32 %v934_v61, %v935_v63  ;;  %v948_v7 = vmax.f32 %v2656_v59, %v2664_v4 }
 0x1c4   : > { %v928_v8 = vrot.slane %v927_v2, 1 }
 0x1c5   : > { %v937_v9 = vrot.slane %v936_v6, 1  ;;  %v2670_v10 = vpop.f32.mrb[12].mxu0 }
 0x1c6   : > { %v929_v11 = vmax.f32 %v927_v2, %v928_v8  ;;  %v940_v12 = vmax.f32 %v939_v3, %v2670_v10  ;;  %v2673_v13 = vpop.f32.mrb[13].mxu0 }
 0x1c7   : > { %v938_v15 = vmax.f32 %v936_v6, %v937_v9  ;;  %v949_v16 = vmax.f32 %v948_v7, %v2673_v13 }
 0x1c8   : > { %v993_v17 = vsub.f32 %v2633_v38, %v929_v11  ;;  %v995_v18 = vsub.f32 %v640_v40, %v929_v11  ;;  %v997_v19 = vsub.f32 %v646_v45, %v929_v11  ;;  %v999_v20 = vsub.f32 %v652_v50, %v929_v11  ;;  %v407_v40 = vpop.trf.xlu1 }
 0x1c9   : > { %v994_v21 = vsub.f32 %v2635_v39, %v938_v15  ;;  %v996_v22 = vsub.f32 %v2638_v42, %v938_v15  ;;  %v998_v23 = vsub.f32 %v2644_v47, %v938_v15  ;;  %v1000_v24 = vsub.f32 %v2649_v52, %v938_v15  ;;  %v2683_v25 = vpop.f32.mrb[14].mxu0  ;;  %1977 = vmatmul.mubr.msk.f32.gmra.mrb[78].mxu0 %vm418_vm1, %v407_v40 }
 0x1ca   : > { %v1025_v26 = vmul.f32 1.442695, %v993_v17  ;;  %v1029_v27 = vmul.f32 1.442695, %v995_v18  ;;  %v1033_v28 = vmul.f32 1.442695, %v997_v19  ;;  %v941_v29 = vmax.f32 %v940_v12, %v2683_v25  ;;  %872 = vmatprep.mubr.f32.mxu0 %v2372_v0 }
 0x1cb   : > { %v1037_v31 = vmul.f32 1.442695, %v999_v20  ;;  %v1027_v32 = vmul.f32 1.442695, %v994_v21  ;;  %v2687_v34 = vpop.f32.mrb[15].mxu0 }
 0x1cc   : > { %2058 = vpow2.f32 %v1025_v26  ;;  %v942_v33 = vrot.slane %v941_v29, 4  ;;  %v1031_v35 = vmul.f32 1.442695, %v996_v22  ;;  %v950_v36 = vmax.f32 %v949_v16, %v2687_v34  ;;  %v408_v50 = vpop.trf.xlu1 }
 0x1cd   : > { %2060 = vpow2.f32 %v1029_v27  ;;  %v2691_v37 = vpop.f32.mrb[16].mxu0  ;;  %v1035_v41 = vmul.f32 1.442695, %v998_v23  ;;  %v1039_v44 = vmul.f32 1.442695, %v1000_v24  ;;  %1978 = vmatmul.mubr.msk.f32.gmra.mrb[80].mxu0 %vm418_vm1, %v408_v50 }
 0x1ce   : > { %2062 = vpow2.f32 %v1033_v28  ;;  %v943_v38 = vmax.f32 %v941_v29, %v942_v33  ;;  %v2693_v39 = vpop.f32.mrb[17].mxu0  ;;  %v951_v42 = vrot.slane %v950_v36, 4  ;;  %878 = vmatprep.mubr.f32.mxu0 %v2372_v0 }
 0x1cf   : > { %2064 = vpow2.f32 %v1037_v31 }
 0x1d0   : > { %2066 = vpow2.f32 %v1027_v32  ;;  %v944_v43 = vrot.slane %v943_v38, 2  ;;  %v952_v45 = vmax.f32 %v950_v36, %v951_v42  ;;  %v409_v62 = vpop.trf.xlu1 }
 0x1d1   : > { %2068 = vpow2.f32 %v1031_v35  ;;  %v2697_v46 = vpop.f32.mrb[18].mxu0  ;;  %1979 = vmatmul.mubr.msk.f32.gmra.mrb[82].mxu0 %vm418_vm1, %v409_v62 }
 0x1d2   : > { %v945_v47 = vmax.f32 %v943_v38, %v944_v43  ;;  %v957_v48 = vmax.f32 %v2691_v37, %v2697_v46  ;;  %v2701_v49 = vpop.f32.mrb[19].mxu0  ;;  %2070 = vpow2.f32 %v1035_v41  ;;  %v953_v51 = vrot.slane %v952_v45, 2  ;;  %884 = vmatprep.mubr.f32.mxu0 %v2372_v0 }
 0x1d3   : > { %v966_v52 = vmax.f32 %v2693_v39, %v2701_v49  ;;  %2072 = vpow2.f32 %v1039_v44 }
 0x1d4   : > { %v946_v53 = vrot.slane %v945_v47, 1  ;;  %v954_v54 = vmax.f32 %v952_v45, %v953_v51  ;;  %v410_v20 = vpop.trf.xlu1 }
 0x1d5   : > { %v2707_v55 = vpop.f32.mrb[20].mxu0  ;;  %1980 = vmatmul.mubr.msk.f32.gmra.mrb[84].mxu0 %vm418_vm1, %v410_v20 }
 0x1d6   : > { %v2709_v56 = vpop.eup %2058  ;;  %v947_v58 = vmax.f32 %v945_v47, %v946_v53  ;;  %v958_v60 = vmax.f32 %v957_v48, %v2707_v55  ;;  %v2712_v61 = vpop.f32.mrb[21].mxu0  ;;  %v955_v2 = vrot.slane %v954_v54, 1  ;;  %890 = vmatprep.mubr.f32.mxu0 %v2372_v0 }
 0x1d7   : > { %v2714_v63 = vpop.eup %2060  ;;  %v967_v3 = vmax.f32 %v966_v52, %v2712_v61 }
 0x1d8   : > { %v2718_v5 = vpop.eup %2062  ;;  %v1089_v6 = vadd.f32 %v2714_v63, %v2709_v56  ;;  %v1001_v7 = vsub.f32 %v2654_v57, %v947_v58  ;;  %v1003_v8 = vsub.f32 %v2660_v1, %v947_v58  ;;  %v1005_v9 = vsub.f32 %v2670_v10, %v947_v58  ;;  %v411_v31 = vpop.trf.xlu1 }
 0x1d9   : > { %v2726_v11 = vpop.eup %2064  ;;  %v1007_v12 = vsub.f32 %v2683_v25, %v947_v58  ;;  %v956_v14 = vmax.f32 %v954_v54, %v955_v2  ;;  %v2729_v15 = vpop.f32.mrb[22].mxu0  ;;  %1981 = vmatmul.mubr.msk.f32.gmra.mrb[86].mxu0 %vm418_vm1, %v411_v31 }
 0x1da   : > { %v2731_v16 = vpop.eup %2066  ;;  %v1090_v17 = vadd.f32 %v2718_v5, %v1089_v6  ;;  %v1041_v18 = vmul.f32 1.442695, %v1001_v7  ;;  %v1045_v19 = vmul.f32 1.442695, %v1003_v8  ;;  %v1049_v57 = vmul.f32 1.442695, %v1005_v9  ;;  %896 = vmatprep.mubr.f32.mxu0 %v2372_v0 }
 0x1db   : > { %v2734_v1 = vpop.eup %2068  ;;  %v1053_v10 = vmul.f32 1.442695, %v1007_v12  ;;  %v1002_v21 = vsub.f32 %v2656_v59, %v956_v14  ;;  %v1004_v22 = vsub.f32 %v2664_v4, %v956_v14  ;;  %v1006_v23 = vsub.f32 %v2673_v13, %v956_v14  ;;  %v2739_v24 = vpop.f32.mrb[23].mxu0 }
 0x1dc   : > { %v1091_v25 = vadd.f32 %v2726_v11, %v1090_v17  ;;  %v1098_v26 = vadd.f32 %v2734_v1, %v2731_v16  ;;  %2074 = vpow2.f32 %v1041_v18  ;;  %v1008_v27 = vsub.f32 %v2687_v34, %v956_v14  ;;  %v2747_v28 = vpop.eup %2070  ;;  %v412_v51 = vpop.trf.xlu1 }
 0x1dd   : > { %2076 = vpow2.f32 %v1045_v19  ;;  %v1043_v59 = vmul.f32 1.442695, %v1002_v21  ;;  %v1047_v4 = vmul.f32 1.442695, %v1004_v22  ;;  %v2750_v30 = vpop.f32.mrb[24].mxu0  ;;  %v2752_v32 = vpop.eup %2072  ;;  %v959_v34 = vmax.f32 %v958_v60, %v2729_v15  ;;  %1982 = vmatmul.mubr.msk.f32.gmra.mrb[88].mxu0 %vm418_vm1, %v412_v51 }
 0x1de   : > { %v1092_v13 = vrot.slane %v1091_v25, 4  ;;  %v1099_v29 = vadd.f32 %v2747_v28, %v1098_v26  ;;  %2078 = vpow2.f32 %v1049_v57  ;;  %v1051_v33 = vmul.f32 1.442695, %v1006_v23  ;;  %v2756_v36 = vpop.f32.mrb[25].mxu0  ;;  %902 = vmatprep.mubr.f32.mxu0 %v2372_v0 }
 0x1df   : > { %2080 = vpow2.f32 %v1053_v10  ;;  %v968_v35 = vmax.f32 %v967_v3, %v2739_v24  ;;  %v1055_v41 = vmul.f32 1.442695, %v1008_v27  ;;  %v960_v42 = vrot.slane %v959_v34, 4 }
 0x1e0   : > { %v1093_v38 = vadd.f32 %v1092_v13, %v1091_v25  ;;  %v1100_v40 = vadd.f32 %v2752_v32, %v1099_v29  ;;  %2082 = vpow2.f32 %v1043_v59  ;;  %v413_v14 = vpop.trf.xlu1 }
 0x1e1   : > { %2084 = vpow2.f32 %v1047_v4  ;;  %v969_v43 = vrot.slane %v968_v35, 4  ;;  %v2761_v44 = vpop.f32.mrb[26].mxu0  ;;  %v961_v52 = vmax.f32 %v959_v34, %v960_v42  ;;  %1983 = vmatmul.mubr.msk.f32.gmra.mrb[90].mxu0 %vm418_vm1, %v413_v14 }
 0x1e2   : > { %v1094_v45 = vrot.slane %v1093_v38, 2  ;;  %v1101_v47 = vrot.slane %v1100_v40, 4  ;;  %v975_v48 = vmax.f32 %v2750_v30, %v2761_v44  ;;  %v2765_v50 = vpop.f32.mrb[27].mxu0  ;;  %2086 = vpow2.f32 %v1051_v33  ;;  %908 = vmatprep.mubr.f32.mxu0 %v2372_v0 }
 0x1e3   : > { %v970_v53 = vmax.f32 %v968_v35, %v969_v43  ;;  %v984_v54 = vmax.f32 %v2756_v36, %v2765_v50  ;;  %2088 = vpow2.f32 %v1055_v41  ;;  %v962_v62 = vrot.slane %v961_v52, 2 }
 0x1e4   : > { %v1095_v58 = vadd.f32 %v1094_v45, %v1093_v38  ;;  %v1102_v60 = vadd.f32 %v1101_v47, %v1100_v40  ;;  %v414_v33 = vpop.trf.xlu1 }
 0x1e5   : > { %v971_v2 = vrot.slane %v970_v53, 2  ;;  %v2771_v3 = vpop.f32.mrb[28].mxu0  ;;  %v963_v18 = vmax.f32 %v961_v52, %v962_v62  ;;  %1984 = vmatmul.mubr.msk.f32.gmra.mrb[92].mxu0 %vm418_vm1, %v414_v33 }
 0x1e6   : > { %v2773_v6 = vpop.eup %2074  ;;  %v1096_v7 = vrot.slane %v1095_v58, 1  ;;  %v1103_v8 = vrot.slane %v1102_v60, 2  ;;  %v976_v9 = vmax.f32 %v975_v48, %v2771_v3  ;;  %v2776_v12 = vpop.f32.mrb[29].mxu0  ;;  %914 = vmatprep.mubr.f32.mxu0 %v2372_v0 }
 0x1e7   : > { %v2778_v17 = vpop.eup %2076  ;;  %v972_v19 = vmax.f32 %v970_v53, %v971_v2  ;;  %v985_v57 = vmax.f32 %v984_v54, %v2776_v12  ;;  %v964_v25 = vrot.slane %v963_v18, 1 }
 0x1e8   : > { %v2782_v20 = vpop.eup %2078  ;;  %v1097_v10 = vadd.f32 %v1096_v7, %v1095_v58  ;;  %v1104_v21 = vadd.f32 %v1103_v8, %v1102_v60  ;;  %v1107_v22 = vadd.f32 %v2778_v17, %v2773_v6  ;;  %v415_v0 = vpop.trf.xlu1 }
 0x1e9   : > { %v2787_v23 = vpop.eup %2080  ;;  %v973_v26 = vrot.slane %v972_v19, 1  ;;  %v2789_v27 = vpop.f32.mrb[30].mxu0  ;;  %v965_v35 = vmax.f32 %v963_v18, %v964_v25  ;;  %1985 = vmatmul.mubr.msk.f32.gmra.mrb[94].mxu0 %vm418_vm1, %v415_v0 }
 0x1ea   : > { %v2791_v59 = vpop.eup %2082  ;;  %2090 = vrcp.f32 %v1097_v10  ;;  %v1105_v4 = vrot.slane %v1104_v21, 1  ;;  %v1108_v13 = vadd.f32 %v2782_v20, %v1107_v22  ;;  %v977_v29 = vmax.f32 %v976_v9, %v2789_v27  ;;  %v2795_v31 = vpop.f32.mrb[31].mxu0 }
 0x1eb   : > { %v2797_v34 = vpop.eup %2084  ;;  %v974_v38 = vmax.f32 %v972_v19, %v973_v26  ;;  %v986_v40 = vmax.f32 %v985_v57, %v2795_v31  ;;  %v1009_v48 = vsub.f32 %v2691_v37, %v965_v35  ;;  %v1011_v51 = vsub.f32 %v2697_v46, %v965_v35 }
 0x1ec   : > { %v1106_v41 = vadd.f32 %v1105_v4, %v1104_v21  ;;  %v1109_v42 = vadd.f32 %v2787_v23, %v1108_v13  ;;  %v1116_v43 = vadd.f32 %v2797_v34, %v2791_v59  ;;  %v978_v45 = vrot.slane %v977_v29, 4  ;;  %v2805_v47 = vpop.eup %2086 }
 0x1ed   : > { %v1013_v52 = vsub.f32 %v2707_v55, %v965_v35  ;;  %v1015_v53 = vsub.f32 %v2729_v15, %v965_v35  ;;  %v2811_v54 = vpop.f32.mrb[32].mxu0  ;;  %v1010_v62 = vsub.f32 %v2693_v39, %v974_v38  ;;  %v2817_v7 = vpop.eup %2088  ;;  %v1057_v37 = vmul.f32 1.442695, %v1009_v48 }
 0x1ee   : > { %2092 = vrcp.f32 %v1106_v41  ;;  %v1110_v58 = vrot.slane %v1109_v42, 4  ;;  %v1117_v60 = vadd.f32 %v2805_v47, %v1116_v43  ;;  %v2815_v2 = vpop.f32.mrb[33].mxu0  ;;  %v1061_v8 = vmul.f32 1.442695, %v1011_v51 }
 0x1ef   : > { %v1065_v46 = vmul.f32 1.442695, %v1013_v52  ;;  %v1012_v55 = vsub.f32 %v2701_v49, %v974_v38  ;;  %v1069_v14 = vmul.f32 1.442695, %v1015_v53  ;;  %v1014_v18 = vsub.f32 %v2712_v61, %v974_v38 }
 0x1f0   : > { %v1111_v15 = vadd.f32 %v1110_v58, %v1109_v42  ;;  %v1118_v9 = vadd.f32 %v2817_v7, %v1117_v60  ;;  %2094 = vpow2.f32 %v1057_v37  ;;  %v1016_v39 = vsub.f32 %v2739_v24, %v974_v38 }
 0x1f1   : > { %v1059_v19 = vmul.f32 1.442695, %v1010_v62  ;;  %v1063_v57 = vmul.f32 1.442695, %v1012_v55  ;;  %v2824_v10 = vpop.f32.mrb[34].mxu0  ;;  %2096 = vpow2.f32 %v1061_v8  ;;  %v979_v4 = vmax.f32 %v977_v29, %v978_v45 }
 0x1f2   : > { %v1112_v21 = vrot.slane %v1111_v15, 2  ;;  %v1119_v22 = vrot.slane %v1118_v9, 4  ;;  %v1067_v25 = vmul.f32 1.442695, %v1014_v18  ;;  %v2826_v49 = vpop.f32.mrb[35].mxu0  ;;  %2098 = vpow2.f32 %v1065_v46 }
 0x1f3   : > { %v1071_v26 = vmul.f32 1.442695, %v1016_v39  ;;  %v987_v13 = vrot.slane %v986_v40, 4  ;;  %2100 = vpow2.f32 %v1069_v14  ;;  %v1201_v24 = vmax.f32 %v2811_v54, %v2815_v2 }
 0x1f4   : > { %v2091_v33 = vpop.eup %2090  ;;  %v1113_v35 = vadd.f32 %v1112_v21, %v1111_v15  ;;  %v1120_v61 = vadd.f32 %v1119_v22, %v1118_v9  ;;  %2102 = vpow2.f32 %v1059_v19  ;;  %v980_v38 = vrot.slane %v979_v4, 2 }
 0x1f5   : > { %v988_v41 = vmax.f32 %v986_v40, %v987_v13  ;;  %v1204_v42 = vmax.f32 %v2824_v10, %v2826_v49  ;;  %v2832_v43 = vpop.f32.mrb[36].mxu0  ;;  %2104 = vpow2.f32 %v1063_v57  ;;  %1202 = vmax.xlane.f32.xlu1 %v1201_v24  ;;  %v2837_v45 = vmul.f32 %v2091_v33, %v2709_v56 }
 0x1f6   : > { %v1114_v48 = vrot.slane %v1113_v35, 1  ;;  %v1121_v51 = vrot.slane %v1120_v61, 2  ;;  %v2834_v29 = vpop.f32.mrb[37].mxu0  ;;  %2106 = vpow2.f32 %v1067_v25  ;;  %v981_v52 = vmax.f32 %v979_v4, %v980_v38 }
 0x1f7   : > { %v989_v53 = vrot.slane %v988_v41, 2  ;;  %1205 = vmax.xlane.f32.xlu0 %v1204_v42  ;;  %v1207_v40 = vmax.f32 %v2832_v43, %v2834_v29  ;;  %2108 = vpow2.f32 %v1071_v26  ;;  %v2842_v0 = vmul.f32 %v2091_v33, %v2714_v63 }
 0x1f8   : > { %v2093_v58 = vpop.eup %2092  ;;  %v1115_v60 = vadd.f32 %v1114_v48, %v1113_v35  ;;  %v1122_v62 = vadd.f32 %v1121_v51, %v1120_v61  ;;  %v982_v37 = vrot.slane %v981_v52, 1  ;;  %v2871_v25 = vmul.f32 %v2091_v33, %v2718_v5 }
 0x1f9   : > { %v990_v8 = vmax.f32 %v988_v41, %v989_v53  ;;  %v2844_v46 = vpop.f32.mrb[38].mxu0  ;;  %v2847_v56 = vmul.f32 %v2093_v58, %v2731_v16  ;;  %v2850_v55 = vmul.f32 %v2093_v58, %v2734_v1  ;;  %1208 = vmax.xlane.f32.xlu1 %v1207_v40  ;;  %v2857_v63 = vmul.f32 %v2093_v58, %v2747_v28 }
 0x1fa   : > { %2110 = vrcp.f32 %v1115_v60  ;;  %v1123_v15 = vrot.slane %v1122_v62, 1  ;;  %v2852_v9 = vpop.f32.mrb[39].mxu0  ;;  %v2859_v18 = vpop.eup %2094  ;;  %v983_v39 = vmax.f32 %v981_v52, %v982_v37  ;;  %v2868_v22 = vmul.f32 %v2093_v58, %v2752_v32 }
 0x1fb   : > { %v991_v19 = vrot.slane %v990_v8, 1  ;;  %v1210_v16 = vmax.f32 %v2844_v46, %v2852_v9  ;;  %v2865_v57 = vpop.eup %2096  ;;  %v2874_v28 = vmul.f32 %v2091_v33, %v2726_v11 }
 0x1fc   : > { %v1124_v21 = vadd.f32 %v1123_v15, %v1122_v62  ;;  %v2876_v26 = vpop.eup %2098  ;;  %v1125_v4 = vadd.f32 %v2865_v57, %v2859_v18  ;;  %v1017_v13 = vsub.f32 %v2750_v30, %v983_v39  ;;  %v1019_v35 = vsub.f32 %v2761_v44, %v983_v39 }
 0x1fd   : > { %v1021_v61 = vsub.f32 %v2771_v3, %v983_v39  ;;  %v2883_v24 = vpop.f32.mrb[40].mxu0  ;;  %v2885_v32 = vpop.eup %2100  ;;  %v1023_v5 = vsub.f32 %v2789_v27, %v983_v39  ;;  %v992_v11 = vmax.f32 %v990_v8, %v991_v19  ;;  %1211 = vmax.xlane.f32.xlu1 %v1210_v16 }
 0x1fe   : > { %2112 = vrcp.f32 %v1124_v21  ;;  %v2888_v33 = vpop.f32.mrb[41].mxu0  ;;  %v2892_v41 = vpop.eup %2102  ;;  %v1126_v30 = vadd.f32 %v2876_v26, %v1125_v4  ;;  %v1073_v44 = vmul.f32 1.442695, %v1017_v13  ;;  %v1077_v3 = vmul.f32 1.442695, %v1019_v35 }
 0x1ff   : > { %v1081_v42 = vmul.f32 1.442695, %v1021_v61  ;;  %v2895_v48 = vpop.eup %2104  ;;  %v1085_v51 = vmul.f32 1.442695, %v1023_v5  ;;  %v1018_v52 = vsub.f32 %v2756_v36, %v992_v11  ;;  %v1020_v27 = vsub.f32 %v2765_v50, %v992_v11 }
 0x200   : > { %v1022_v53 = vsub.f32 %v2776_v12, %v992_v11  ;;  %v2900_v40 = vpop.eup %2106  ;;  %v1127_v58 = vadd.f32 %v2885_v32, %v1126_v30  ;;  %v1134_v60 = vadd.f32 %v2895_v48, %v2892_v41  ;;  %2114 = vpow2.f32 %v1073_v44 }
 0x201   : > { %v1024_v62 = vsub.f32 %v2795_v31, %v992_v11  ;;  %v2906_v37 = vpop.f32.mrb[42].mxu0  ;;  %v2908_v8 = vpop.eup %2108  ;;  %2116 = vpow2.f32 %v1077_v3  ;;  %v1075_v36 = vmul.f32 1.442695, %v1018_v52  ;;  %v1079_v15 = vmul.f32 1.442695, %v1020_v27 }
 0x202   : > { %v1083_v50 = vmul.f32 1.442695, %v1022_v53  ;;  %v1128_v39 = vrot.slane %v1127_v58, 4  ;;  %v1135_v12 = vadd.f32 %v2900_v40, %v1134_v60  ;;  %2118 = vpow2.f32 %v1081_v42  ;;  %v2911_v16 = vpop.f32.mrb[43].mxu0 }
 0x203   : > { %v1087_v19 = vmul.f32 1.442695, %v1024_v62  ;;  %2120 = vpow2.f32 %v1085_v51  ;;  %v1213_v31 = vmax.f32 %v2883_v24, %v2888_v33  ;;  %v1216_v4 = vmax.f32 %v2906_v37, %v2911_v16 }
 0x204   : > { %v2111_v21 = vpop.eup %2110  ;;  %v1129_v35 = vadd.f32 %v1128_v39, %v1127_v58  ;;  %v1136_v61 = vadd.f32 %v2908_v8, %v1135_v12  ;;  %2122 = vpow2.f32 %v1075_v36 }
 0x205   : > { %v2920_v5 = vpop.f32.mrb[44].mxu0  ;;  %v2923_v11 = vmul.f32 %v2111_v21, %v2773_v6  ;;  %2124 = vpow2.f32 %v1079_v15  ;;  %1214 = vmax.xlane.f32.xlu1 %v1213_v31  ;;  %v2928_v44 = vmul.f32 %v2111_v21, %v2778_v17  ;;  %v2931_v3 = vmul.f32 %v2111_v21, %v2782_v20 }
 0x206   : > { %v2925_v30 = vpop.f32.mrb[45].mxu0  ;;  %v2934_v42 = vmul.f32 %v2111_v21, %v2787_v23  ;;  %v1130_v51 = vrot.slane %v1129_v35, 2  ;;  %v1137_v52 = vrot.slane %v1136_v61, 4  ;;  %2126 = vpow2.f32 %v1083_v50 }
 0x207   : > { %3582 = vst [vmem:[#allocation11_spill] sm:$0xff] %v2923_v11  ;;  %3583 = vst [vmem:[#allocation12_spill] sm:$0xff] %v2928_v44  ;;  %v1219_v27 = vmax.f32 %v2920_v5, %v2925_v30  ;;  %2128 = vpow2.f32 %v1087_v19 }
 0x208   : > { %3584 = vst [vmem:[#allocation13_spill] sm:$0xff] %v2931_v3  ;;  %3585 = vst [vmem:[#allocation14_spill] sm:$0xff] %v2934_v42  ;;  %v2113_v6 = vpop.eup %2112  ;;  %v1131_v58 = vadd.f32 %v1130_v51, %v1129_v35  ;;  %v1138_v60 = vadd.f32 %v1137_v52, %v1136_v61 }
 0x209   : > { %v2942_v20 = vpop.f32.mrb[46].mxu0  ;;  %v2945_v23 = vmul.f32 %v2113_v6, %v2791_v59  ;;  %v2948_v62 = vmul.f32 %v2113_v6, %v2797_v34  ;;  %1217 = vmax.xlane.f32.xlu1 %v1216_v4  ;;  %v2953_v15 = vmul.f32 %v2113_v6, %v2805_v47  ;;  %v2956_v50 = vmul.f32 %v2113_v6, %v2817_v7 }
 0x20a   : > { %v2950_v36 = vpop.f32.mrb[47].mxu0  ;;  %v2958_v39 = vpop.eup %2114  ;;  %v1132_v12 = vrot.slane %v1131_v58, 1  ;;  %v1139_v21 = vrot.slane %v1138_v60, 2 }
 0x20b   : > { %3586 = vst [vmem:[#allocation15_spill] sm:$0xff] %v2945_v23  ;;  %3587 = vst [vmem:[#allocation16_spill] sm:$0xff] %v2948_v62  ;;  %v1222_v59 = vmax.f32 %v2942_v20, %v2950_v36  ;;  %v2964_v19 = vpop.eup %2116 }
 0x20c   : > { %3588 = vst [vmem:[#allocation17_spill] sm:$0xff] %v2953_v15  ;;  %3589 = vst [vmem:[#allocation18_spill] sm:$0xff] %v2956_v50  ;;  %v2968_v47 = vpop.eup %2118  ;;  %v1133_v4 = vadd.f32 %v1132_v12, %v1131_v58  ;;  %v1140_v7 = vadd.f32 %v1139_v21, %v1138_v60  ;;  %v1143_v35 = vadd.f32 %v2964_v19, %v2958_v39 }
 0x20d   : > { %v2972_v61 = vpop.f32.mrb[48].mxu0  ;;  %v2974_v51 = vpop.eup %2120  ;;  %1220 = vmax.xlane.f32.xlu1 %v1219_v27 }
 0x20e   : > { %v2976_v52 = vpop.f32.mrb[49].mxu0  ;;  %v2978_v6 = vpop.eup %2122  ;;  %2130 = vrcp.f32 %v1133_v4  ;;  %v1141_v17 = vrot.slane %v1140_v7, 1  ;;  %v1144_v31 = vadd.f32 %v2968_v47, %v1143_v35 }
 0x20f   : > { %v1225_v58 = vmax.f32 %v2972_v61, %v2976_v52  ;;  %v2983_v60 = vpop.eup %2124 }
 0x210   : > { %v1142_v12 = vadd.f32 %v1141_v17, %v1140_v7  ;;  %v1145_v21 = vadd.f32 %v2974_v51, %v1144_v31  ;;  %v1152_v53 = vadd.f32 %v2983_v60, %v2978_v6  ;;  %v2990_v34 = vpop.eup %2126 }
 0x211   : > { %v2988_v27 = vpop.f32.mrb[50].mxu0  ;;  %1223 = vmax.xlane.f32.xlu1 %v1222_v59  ;;  %v2997_v17 = vpop.eup %2128 }
 0x212   : > { %v2992_v4 = vpop.f32.mrb[51].mxu0  ;;  %2132 = vrcp.f32 %v1142_v12  ;;  %v1146_v35 = vrot.slane %v1145_v21, 4  ;;  %v1153_v13 = vadd.f32 %v2990_v34, %v1152_v53 }
 0x213   : > { %v1228_v38 = vmax.f32 %v2988_v27, %v2992_v4 }
 0x214   : > { %v1147_v31 = vadd.f32 %v1146_v35, %v1145_v21  ;;  %v1154_v7 = vadd.f32 %v2997_v17, %v1153_v13 }
 0x215   : > { %v3000_v14 = vpop.f32.mrb[52].mxu0  ;;  %1226 = vmax.xlane.f32.xlu1 %v1225_v58 }
 0x216   : > { %v3002_v1 = vpop.f32.mrb[53].mxu0  ;;  %v1148_v59 = vrot.slane %v1147_v31, 2  ;;  %v1155_v3 = vrot.slane %v1154_v7, 4 }
 0x217   : > { %v1231_v12 = vmax.f32 %v3000_v14, %v3002_v1 }
 0x218   : > { %v2131_v42 = vpop.eup %2130  ;;  %v1149_v53 = vadd.f32 %v1148_v59, %v1147_v31  ;;  %v1156_v15 = vadd.f32 %v1155_v3, %v1154_v7 }
 0x219   : > { %v3006_v50 = vpop.f32.mrb[54].mxu0  ;;  %1229 = vmax.xlane.f32.xlu1 %v1228_v38  ;;  %v3011_v13 = vmul.f32 %v2131_v42, %v2859_v18  ;;  %v3014_v58 = vmul.f32 %v2131_v42, %v2865_v57  ;;  %v3017_v21 = vmul.f32 %v2131_v42, %v2876_v26  ;;  %v3020_v35 = vmul.f32 %v2131_v42, %v2885_v32 }
 0x21a   : > { %v3008_v11 = vpop.f32.mrb[55].mxu0  ;;  %v1150_v44 = vrot.slane %v1149_v53, 1  ;;  %v1157_v31 = vrot.slane %v1156_v15, 2 }
 0x21b   : > { %3590 = vst [vmem:[#allocation19_spill] sm:$0xff] %v3011_v13  ;;  %3591 = vst [vmem:[#allocation20_spill] sm:$0xff] %v3014_v58  ;;  %v1234_v3 = vmax.f32 %v3006_v50, %v3008_v11 }
 0x21c   : > { %3592 = vst [vmem:[#allocation21_spill] sm:$0xff] %v3017_v21  ;;  %3593 = vst [vmem:[#allocation22_spill] sm:$0xff] %v3020_v35  ;;  %v2133_v7 = vpop.eup %2132  ;;  %v1151_v57 = vadd.f32 %v1150_v44, %v1149_v53  ;;  %v1158_v59 = vadd.f32 %v1157_v31, %v1156_v15 }
 0x21d   : > { %v3028_v23 = vpop.f32.mrb[56].mxu0  ;;  %1232 = vmax.xlane.f32.xlu1 %v1231_v12  ;;  %v3033_v32 = vmul.f32 %v2133_v7, %v2892_v41  ;;  %v3036_v42 = vmul.f32 %v2133_v7, %v2895_v48  ;;  %v3039_v62 = vmul.f32 %v2133_v7, %v2900_v40  ;;  %v3042_v38 = vmul.f32 %v2133_v7, %v2908_v8 }
 0x21e   : > { %v3030_v26 = vpop.f32.mrb[57].mxu0  ;;  %2134 = vrcp.f32 %v1151_v57  ;;  %v1159_v44 = vrot.slane %v1158_v59, 1 }
 0x21f   : > { %3594 = vst [vmem:[#allocation23_spill] sm:$0xff] %v3039_v62  ;;  %3595 = vst [vmem:[#allocation24_spill] sm:$0xff] %v3042_v38  ;;  %v1237_v15 = vmax.f32 %v3028_v23, %v3030_v26 }
 0x220   : > { %v1160_v53 = vadd.f32 %v1159_v44, %v1158_v59 }
 0x221   : > { %v3050_v48 = vpop.f32.mrb[58].mxu0  ;;  %1235 = vmax.xlane.f32.xlu1 %v1234_v3 }
 0x222   : > { %v3052_v40 = vpop.f32.mrb[59].mxu0  ;;  %2136 = vrcp.f32 %v1160_v53 }
 0x223   : > { %v1240_v8 = vmax.f32 %v3050_v48, %v3052_v40 }
 0x225   : > { %v3056_v31 = vpop.f32.mrb[60].mxu0  ;;  %1238 = vmax.xlane.f32.xlu1 %v1237_v15 }
 0x226   : > { %v3058_v7 = vpop.f32.mrb[61].mxu0 }
 0x227   : > { %v1243_v57 = vmax.f32 %v3056_v31, %v3058_v7 }
 0x228   : > { %v2135_v18 = vpop.eup %2134 }
 0x229   : > { %v3062_v41 = vpop.f32.mrb[62].mxu0  ;;  %1241 = vmax.xlane.f32.xlu1 %v1240_v8  ;;  %v3067_v3 = vmul.f32 %v2135_v18, %v2958_v39  ;;  %v3070_v44 = vmul.f32 %v2135_v18, %v2964_v19  ;;  %v3073_v53 = vmul.f32 %v2135_v18, %v2968_v47  ;;  %v3076_v15 = vmul.f32 %v2135_v18, %v2974_v51 }
 0x22a   : > { %v3064_v59 = vpop.f32.mrb[63].mxu0 }
 0x22b   : > { %3596 = vst [vmem:[#allocation25_spill] sm:$0xff] %v3067_v3  ;;  %3597 = vst [vmem:[#allocation26_spill] sm:$0xff] %v3070_v44  ;;  %v1246_v12 = vmax.f32 %v3062_v41, %v3064_v59 }
 0x22c   : > { %3598 = vst [vmem:[#allocation27_spill] sm:$0xff] %v3073_v53  ;;  %3599 = vst [vmem:[#allocation28_spill] sm:$0xff] %v3076_v15  ;;  %v2137_v39 = vpop.eup %2136 }
 0x22d   : > { %1244 = vmax.xlane.f32.xlu1 %v1243_v57  ;;  %v3085_v19 = vmul.f32 %v2137_v39, %v2978_v6  ;;  %v3088_v47 = vmul.f32 %v2137_v39, %v2983_v60  ;;  %v3091_v51 = vmul.f32 %v2137_v39, %v2990_v34  ;;  %v3094_v18 = vmul.f32 %v2137_v39, %v2997_v17  ;;  %v3104_v39 = vpop.f32.mrb[64].mxu0 }
 0x22f   : > { %3600 = vst [vmem:[#allocation29_spill] sm:$0xff] %v3085_v19  ;;  %3601 = vst [vmem:[#allocation30_spill] sm:$0xff] %v3088_v47  ;;  %v828_v47 = vpop.f32.mrb[65].mxu0 }
 0x230   : > { %3602 = vst [vmem:[#allocation31_spill] sm:$0xff] %v3091_v51  ;;  %3603 = vst [vmem:[#allocation32_spill] sm:$0xff] %v3094_v18 }
 0x231   : > { %1247 = vmax.xlane.f32.xlu1 %v1246_v12 }
 0x282   : > { %v1203_v57 = vpop.xlane.xlu1 %1202 }
 0x283   : > { %v1249_v6 = vsub.f32 %v2811_v54, %v1203_v57  ;;  %v1250_v53 = vsub.f32 %v2815_v2, %v1203_v57 }
 0x284   : > { %v1206_v60 = vpop.xlane.xlu0 %1205 }
 0x285   : > { %v1251_v15 = vsub.f32 %v2824_v10, %v1206_v60  ;;  %v1252_v34 = vsub.f32 %v2826_v49, %v1206_v60  ;;  %v1281_v3 = vmul.f32 1.442695, %v1249_v6  ;;  %v1283_v17 = vmul.f32 1.442695, %v1250_v53  ;;  %v3108_v10 = vpop.f32.mrb[66].mxu0 }
 0x286   : > { %v1209_v19 = vpop.xlane.xlu1 %1208 }
 0x287   : > { %v1285_v44 = vmul.f32 1.442695, %v1251_v15  ;;  %v1287_v8 = vmul.f32 1.442695, %v1252_v34  ;;  %2138 = vpow2.f32 %v1281_v3  ;;  %v1253_v12 = vsub.f32 %v2832_v43, %v1209_v19  ;;  %v834_v15 = vpop.f32.mrb[67].mxu0 }
 0x288   : > { %v1254_v54 = vsub.f32 %v2834_v29, %v1209_v19  ;;  %2140 = vpow2.f32 %v1283_v17  ;;  %v1442_v43 = vpack.c.bf16 %v834_v15, %v828_v47 }
 0x289   : > { %2142 = vpow2.f32 %v1285_v44  ;;  %v1289_v2 = vmul.f32 1.442695, %v1253_v12  ;;  %v3114_v44 = vpop.f32.mrb[68].mxu0 }
 0x28a   : > { %v1291_v57 = vmul.f32 1.442695, %v1254_v54  ;;  %2144 = vpow2.f32 %v1287_v8  ;;  %v1212_v49 = vpop.xlane.xlu1 %1211  ;;  %1505 = vmatprep.mubr.bf16.mxu1 %v1442_v43  ;;  %v3116_v60 = vpop.f32.mrb[69].mxu0 }
 0x28b   : > { %2146 = vpow2.f32 %v1289_v2  ;;  %v1255_v6 = vsub.f32 %v2844_v46, %v1212_v49  ;;  %v1256_v3 = vsub.f32 %v2852_v9, %v1212_v49  ;;  %v3120_v34 = vpop.f32.mrb[70].mxu0 }
 0x28c   : > { %2148 = vpow2.f32 %v1291_v57  ;;  %v3126_v47 = vpop.f32.mrb[71].mxu0 }
 0x28d   : > { %v1293_v29 = vmul.f32 1.442695, %v1255_v6  ;;  %v1295_v19 = vmul.f32 1.442695, %v1256_v3 }
 0x28f   : > { %2150 = vpow2.f32 %v1293_v29 }
 0x290   : > { %2152 = vpow2.f32 %v1295_v19 }
 0x291   : > { %v3118_v8 = vpop.eup %2138 }
 0x292   : > { %v3122_v17 = vpop.eup %2140  ;;  %v1215_v46 = vpop.xlane.xlu1 %1214 }
 0x293   : > { %v3128_v12 = vpop.eup %2142  ;;  %v1257_v54 = vsub.f32 %v2883_v24, %v1215_v46  ;;  %v1258_v2 = vsub.f32 %v2888_v33, %v1215_v46  ;;  %v1345_v57 = vadd.f32 %v3122_v17, %v3118_v8 }
 0x294   : > { %v3136_v15 = vpop.eup %2144 }
 0x295   : > { %v3138_v6 = vpop.eup %2146  ;;  %v1297_v3 = vmul.f32 1.442695, %v1257_v54  ;;  %v1299_v43 = vmul.f32 1.442695, %v1258_v2  ;;  %1346 = vadd.xlane.f32.xlu1 %v1345_v57  ;;  %v1348_v29 = vadd.f32 %v3136_v15, %v3128_v12 }
 0x296   : > { %v3142_v19 = vpop.eup %2148  ;;  %v1218_v24 = vpop.xlane.xlu1 %1217 }
 0x297   : > { %2154 = vpow2.f32 %v1297_v3  ;;  %v1259_v33 = vsub.f32 %v2906_v37, %v1218_v24  ;;  %v1260_v46 = vsub.f32 %v2911_v16, %v1218_v24  ;;  %v1351_v54 = vadd.f32 %v3142_v19, %v3138_v6 }
 0x298   : > { %2156 = vpow2.f32 %v1299_v43 }
 0x299   : > { %v3146_v21 = vpop.eup %2150  ;;  %v1301_v9 = vmul.f32 1.442695, %v1259_v33  ;;  %v1303_v49 = vmul.f32 1.442695, %v1260_v46  ;;  %1349 = vadd.xlane.f32.xlu1 %v1348_v29 }
 0x29a   : > { %v3150_v2 = vpop.eup %2152  ;;  %v1221_v57 = vpop.xlane.xlu1 %1220 }
 0x29b   : > { %2158 = vpow2.f32 %v1301_v9  ;;  %v1261_v53 = vsub.f32 %v2920_v5, %v1221_v57  ;;  %v1262_v3 = vsub.f32 %v2925_v30, %v1221_v57  ;;  %v1354_v37 = vadd.f32 %v3150_v2, %v3146_v21 }
 0x29c   : > { %2160 = vpow2.f32 %v1303_v49 }
 0x29d   : > { %v1305_v16 = vmul.f32 1.442695, %v1261_v53  ;;  %v1307_v43 = vmul.f32 1.442695, %v1262_v3  ;;  %1352 = vadd.xlane.f32.xlu1 %v1351_v54  ;;  %1355 = vadd.xlane.f32.xlu0 %v1354_v37  ;;  %v3166_v3 = vpop.f32.mrb[72].mxu0 }
 0x29e   : > { %v1224_v29 = vpop.xlane.xlu1 %1223  ;;  %3604 = vst [vmem:[#allocation33_spill] sm:$0xff] %v3166_v3 }
 0x29f   : > { %2162 = vpow2.f32 %v1305_v16  ;;  %v1263_v24 = vsub.f32 %v2942_v20, %v1224_v29  ;;  %v1264_v33 = vsub.f32 %v2950_v36, %v1224_v29  ;;  %v3168_v20 = vpop.f32.mrb[73].mxu0 }
 0x2a0   : > { %2164 = vpow2.f32 %v1307_v43  ;;  %v3172_v43 = vpop.f32.mrb[74].mxu0 }
 0x2a1   : > { %v3158_v9 = vpop.eup %2154  ;;  %v1309_v5 = vmul.f32 1.442695, %v1263_v24  ;;  %v1311_v46 = vmul.f32 1.442695, %v1264_v33  ;;  %3605 = vst [vmem:[#allocation34_spill] sm:$0xff] %v3172_v43 }
 0x2a2   : > { %v3160_v30 = vpop.eup %2156  ;;  %v1227_v57 = vpop.xlane.xlu1 %1226 }
 0x2a3   : > { %2166 = vpow2.f32 %v1309_v5  ;;  %v1265_v53 = vsub.f32 %v2972_v61, %v1227_v57  ;;  %v1266_v49 = vsub.f32 %v2976_v52, %v1227_v57  ;;  %v1357_v54 = vadd.f32 %v3160_v30, %v3158_v9 }
 0x2a4   : > { %2168 = vpow2.f32 %v1311_v46  ;;  %v3182_v46 = vpop.f32.mrb[75].mxu0 }
 0x2a5   : > { %v3170_v36 = vpop.eup %2158  ;;  %v1313_v37 = vmul.f32 1.442695, %v1265_v53  ;;  %v1315_v16 = vmul.f32 1.442695, %v1266_v49  ;;  %1358 = vadd.xlane.f32.xlu1 %v1357_v54 }
 0x2a6   : > { %v3174_v29 = vpop.eup %2160  ;;  %v1230_v61 = vpop.xlane.xlu1 %1229 }
 0x2a7   : > { %2170 = vpow2.f32 %v1313_v37  ;;  %v1267_v24 = vsub.f32 %v2988_v27, %v1230_v61  ;;  %v1268_v33 = vsub.f32 %v2992_v4, %v1230_v61  ;;  %v1360_v5 = vadd.f32 %v3174_v29, %v3170_v36 }
 0x2a8   : > { %2172 = vpow2.f32 %v1315_v16  ;;  %v3194_v16 = vpop.f32.mrb[76].mxu0 }
 0x2a9   : > { %v3186_v53 = vpop.eup %2162  ;;  %v1317_v49 = vmul.f32 1.442695, %v1267_v24  ;;  %v1319_v54 = vmul.f32 1.442695, %v1268_v33  ;;  %1361 = vadd.xlane.f32.xlu0 %v1360_v5  ;;  %3606 = vst [vmem:[#allocation35_spill] sm:$0xff] %v3194_v16  ;;  %v3196_v57 = vpop.f32.mrb[77].mxu0 }
 0x2aa   : > { %v3188_v52 = vpop.eup %2164  ;;  %v1233_v37 = vpop.xlane.xlu1 %1232  ;;  %3607 = vst [vmem:[#allocation36_spill] sm:$0xff] %v3196_v57 }
 0x2ab   : > { %2174 = vpow2.f32 %v1317_v49  ;;  %v1269_v27 = vsub.f32 %v3000_v14, %v1233_v37  ;;  %v1270_v4 = vsub.f32 %v3002_v1, %v1233_v37  ;;  %v1363_v61 = vadd.f32 %v3188_v52, %v3186_v53  ;;  %v3200_v5 = vpop.f32.mrb[78].mxu0 }
 0x2ac   : > { %2176 = vpow2.f32 %v1319_v54  ;;  %3608 = vst [vmem:[#allocation37_spill] sm:$0xff] %v3200_v5  ;;  %v3206_v37 = vpop.f32.mrb[79].mxu0 }
 0x2ad   : > { %v3198_v51 = vpop.eup %2166  ;;  %v1321_v24 = vmul.f32 1.442695, %v1269_v27  ;;  %v1323_v33 = vmul.f32 1.442695, %v1270_v4  ;;  %1364 = vadd.xlane.f32.xlu1 %v1363_v61  ;;  %3609 = vst [vmem:[#allocation38_spill] sm:$0xff] %v3206_v37 }
 0x2ae   : > { %v3202_v49 = vpop.eup %2168  ;;  %v1236_v14 = vpop.xlane.xlu1 %1235 }
 0x2af   : > { %2178 = vpow2.f32 %v1321_v24  ;;  %v1271_v54 = vsub.f32 %v3006_v50, %v1236_v14  ;;  %v1272_v18 = vsub.f32 %v3008_v11, %v1236_v14  ;;  %v1366_v27 = vadd.f32 %v3202_v49, %v3198_v51 }
 0x2b0   : > { %2180 = vpow2.f32 %v1323_v33  ;;  %v3222_v33 = vpop.f32.mrb[80].mxu0 }
 0x2b1   : > { %v3214_v61 = vpop.eup %2170  ;;  %v1325_v35 = vmul.f32 1.442695, %v1271_v54  ;;  %v1327_v62 = vmul.f32 1.442695, %v1272_v18  ;;  %1367 = vadd.xlane.f32.xlu0 %v1366_v27  ;;  %3610 = vst [vmem:[#allocation39_spill] sm:$0xff] %v3222_v33  ;;  %v3224_v14 = vpop.f32.mrb[81].mxu0 }
 0x2b2   : > { %v3216_v1 = vpop.eup %2172  ;;  %v1239_v16 = vpop.xlane.xlu1 %1238  ;;  %3611 = vst [vmem:[#allocation40_spill] sm:$0xff] %v3224_v14 }
 0x2b3   : > { %2182 = vpow2.f32 %v1325_v35  ;;  %v1273_v50 = vsub.f32 %v3028_v23, %v1239_v16  ;;  %v1274_v11 = vsub.f32 %v3030_v26, %v1239_v16  ;;  %v1369_v24 = vadd.f32 %v3216_v1, %v3214_v61  ;;  %v3228_v27 = vpop.f32.mrb[82].mxu0 }
 0x2b4   : > { %2184 = vpow2.f32 %v1327_v62  ;;  %3612 = vst [vmem:[#allocation41_spill] sm:$0xff] %v3228_v27  ;;  %v3238_v38 = vpop.f32.mrb[83].mxu0 }
 0x2b5   : > { %v3226_v4 = vpop.eup %2174  ;;  %v1329_v18 = vmul.f32 1.442695, %v1273_v50  ;;  %v1331_v54 = vmul.f32 1.442695, %v1274_v11  ;;  %1370 = vadd.xlane.f32.xlu1 %v1369_v24  ;;  %3613 = vst [vmem:[#allocation42_spill] sm:$0xff] %v3238_v38 }
 0x2b6   : > { %v3230_v35 = vpop.eup %2176  ;;  %v1242_v23 = vpop.xlane.xlu1 %1241 }
 0x2b7   : > { %2186 = vpow2.f32 %v1329_v18  ;;  %v1275_v16 = vsub.f32 %v3050_v48, %v1242_v23  ;;  %v1276_v62 = vsub.f32 %v3052_v40, %v1242_v23  ;;  %v1372_v5 = vadd.f32 %v3230_v35, %v3226_v4 }
 0x2b8   : > { %2188 = vpow2.f32 %v1331_v54  ;;  %v3250_v54 = vpop.f32.mrb[84].mxu0 }
 0x2b9   : > { %v3242_v11 = vpop.eup %2178  ;;  %v1333_v24 = vmul.f32 1.442695, %v1275_v16  ;;  %v1335_v13 = vmul.f32 1.442695, %v1276_v62  ;;  %1373 = vadd.xlane.f32.xlu0 %v1372_v5  ;;  %3614 = vst [vmem:[#allocation43_spill] sm:$0xff] %v3250_v54  ;;  %v3252_v50 = vpop.f32.mrb[85].mxu0 }
 0x2ba   : > { %v3244_v26 = vpop.eup %2180  ;;  %v1245_v18 = vpop.xlane.xlu1 %1244  ;;  %3615 = vst [vmem:[#allocation44_spill] sm:$0xff] %v3252_v50 }
 0x2bb   : > { %2190 = vpow2.f32 %v1333_v24  ;;  %v1277_v48 = vsub.f32 %v3056_v31, %v1245_v18  ;;  %v1278_v40 = vsub.f32 %v3058_v7, %v1245_v18  ;;  %v1375_v23 = vadd.f32 %v3244_v26, %v3242_v11  ;;  %v3256_v62 = vpop.f32.mrb[86].mxu0 }
 0x2bc   : > { %2192 = vpow2.f32 %v1335_v13  ;;  %3616 = vst [vmem:[#allocation45_spill] sm:$0xff] %v3256_v62  ;;  %v3266_v14 = vpop.f32.mrb[87].mxu0 }
 0x2bd   : > { %v3254_v33 = vpop.eup %2182  ;;  %v1337_v16 = vmul.f32 1.442695, %v1277_v48  ;;  %v1339_v5 = vmul.f32 1.442695, %v1278_v40  ;;  %1376 = vadd.xlane.f32.xlu1 %v1375_v23  ;;  %3617 = vst [vmem:[#allocation46_spill] sm:$0xff] %v3266_v14 }
 0x2be   : > { %v3258_v24 = vpop.eup %2184  ;;  %v1248_v31 = vpop.xlane.xlu1 %1247 }
 0x2bf   : > { %2194 = vpow2.f32 %v1337_v16  ;;  %v1279_v18 = vsub.f32 %v3062_v41, %v1248_v31  ;;  %v1280_v13 = vsub.f32 %v3064_v59, %v1248_v31  ;;  %v1378_v27 = vadd.f32 %v3258_v24, %v3254_v33  ;;  %v3276_v59 = vpop.f32.mrb[88].mxu0 }
 0x2c0   : > { %2196 = vpow2.f32 %v1339_v5  ;;  %3618 = vst [vmem:[#allocation47_spill] sm:$0xff] %v3276_v59  ;;  %v3278_v16 = vpop.f32.mrb[89].mxu0 }
 0x2c1   : > { %v3270_v40 = vpop.eup %2186  ;;  %v1341_v23 = vmul.f32 1.442695, %v1279_v18  ;;  %v1343_v38 = vmul.f32 1.442695, %v1280_v13  ;;  %1379 = vadd.xlane.f32.xlu0 %v1378_v27  ;;  %3619 = vst [vmem:[#allocation48_spill] sm:$0xff] %v3278_v16  ;;  %v3282_v31 = vpop.f32.mrb[90].mxu0 }
 0x2c2   : > { %v3272_v7 = vpop.eup %2188  ;;  %3620 = vst [vmem:[#allocation49_spill] sm:$0xff] %v3282_v31  ;;  %v3290_v13 = vpop.f32.mrb[91].mxu0 }
 0x2c3   : > { %2198 = vpow2.f32 %v1341_v23  ;;  %v1381_v41 = vadd.f32 %v3272_v7, %v3270_v40  ;;  %3621 = vst [vmem:[#allocation50_spill] sm:$0xff] %v3290_v13  ;;  %v3300_v62 = vpop.f32.mrb[92].mxu0 }
 0x2c4   : > { %2200 = vpow2.f32 %v1343_v38  ;;  %3622 = vst [vmem:[#allocation51_spill] sm:$0xff] %v3300_v62  ;;  %v3302_v50 = vpop.f32.mrb[93].mxu0 }
 0x2c5   : > { %v3280_v5 = vpop.eup %2190  ;;  %1382 = vadd.xlane.f32.xlu1 %v1381_v41  ;;  %3623 = vst [vmem:[#allocation52_spill] sm:$0xff] %v3302_v50  ;;  %v3306_v59 = vpop.f32.mrb[94].mxu0 }
 0x2c6   : > { %v3284_v48 = vpop.eup %2192  ;;  %3624 = vst [vmem:[#allocation53_spill] sm:$0xff] %v3306_v59  ;;  %v3314_v16 = vpop.f32.mrb[95].mxu0 }
 0x2c7   : > { %v1384_v18 = vadd.f32 %v3284_v48, %v3280_v5  ;;  %3625 = vst [vmem:[#allocation54_spill] sm:$0xff] %v3314_v16 }
 0x2c9   : > { %v3294_v23 = vpop.eup %2194  ;;  %1385 = vadd.xlane.f32.xlu0 %v1384_v18 }
 0x2ca   : > { %v3296_v54 = vpop.eup %2196 }
 0x2cb   : > { %v1387_v41 = vadd.f32 %v3296_v54, %v3294_v23 }
 0x2cd   : > { %v3304_v27 = vpop.eup %2198  ;;  %1388 = vadd.xlane.f32.xlu1 %v1387_v41 }
 0x2ce   : > { %v3308_v31 = vpop.eup %2200 }
 0x2cf   : > { %v1390_v18 = vadd.f32 %v3308_v31, %v3304_v27 }
 0x2d1   : > { %1391 = vadd.xlane.f32.xlu0 %v1390_v18 }
 0x322   : > { %v1347_v14 = vpop.xlane.xlu1 %1346 }
 0x323   : > { %2202 = vrcp.f32 %v1347_v14 }
 0x326   : > { %v1350_v58 = vpop.xlane.xlu1 %1349 }
 0x327   : > { %2204 = vrcp.f32 %v1350_v58 }
 0x32a   : > { %v1353_v41 = vpop.xlane.xlu1 %1352  ;;  %v1356_v57 = vpop.xlane.xlu0 %1355 }
 0x32b   : > { %2206 = vrcp.f32 %v1353_v41 }
 0x32c   : > { %2208 = vrcp.f32 %v1356_v57 }
 0x32d   : > { %v2203_v37 = vpop.eup %2202 }
 0x32e   : > { %v1410_v62 = vmul.f32 %v2203_v37, %v3122_v17  ;;  %v1409_v43 = vmul.f32 %v2203_v37, %v3118_v8 }
 0x331   : > { %v2205_v3 = vpop.eup %2204 }
 0x332   : > { %v1359_v38 = vpop.xlane.xlu1 %1358  ;;  %v1412_v59 = vmul.f32 %v2205_v3, %v3136_v15  ;;  %v1411_v13 = vmul.f32 %v2205_v3, %v3128_v12 }
 0x333   : > { %2210 = vrcp.f32 %v1359_v38 }
 0x334   : > { %v1458_v18 = vpack.c.bf16 %v1412_v59, %v1410_v62  ;;  %v1457_v50 = vpack.c.bf16 %v1411_v13, %v1409_v43 }
 0x335   : > { %v2207_v14 = vpop.eup %2206 }
 0x336   : > { %v2209_v58 = vpop.eup %2208  ;;  %1473 = vmatprep.subr.bf16.mxu1 %v1458_v18  ;;  %v1362_v16 = vpop.xlane.xlu0 %1361  ;;  %v1414_v57 = vmul.f32 %v2207_v14, %v3142_v19  ;;  %v1413_v8 = vmul.f32 %v2207_v14, %v3138_v6 }
 0x337   : > { %2212 = vrcp.f32 %v1362_v16  ;;  %1474 = vmatpush1.bf16.xpose.msra.mxu1 %v1457_v50  ;;  %v1416_v41 = vmul.f32 %v2209_v58, %v3150_v2  ;;  %v1415_v17 = vmul.f32 %v2209_v58, %v3146_v21 }
 0x339   : > { %v1460_v15 = vpack.c.bf16 %v1416_v41, %v1414_v57  ;;  %v1459_v12 = vpack.c.bf16 %v1415_v17, %v1413_v8 }
 0x33a   : > { %v1365_v37 = vpop.xlane.xlu1 %1364 }
 0x33b   : > { %1475 = vmatprep.subr.bf16.mxu1 %v1460_v15  ;;  %2214 = vrcp.f32 %v1365_v37 }
 0x33d   : > { %v2211_v43 = vpop.eup %2210 }
 0x33e   : > { %v1368_v3 = vpop.xlane.xlu0 %1367  ;;  %v1418_v50 = vmul.f32 %v2211_v43, %v3160_v30  ;;  %v1417_v2 = vmul.f32 %v2211_v43, %v3158_v9 }
 0x33f   : > { %2216 = vrcp.f32 %v1368_v3  ;;  %1476 = vmatpush1.bf16.xpose.msra.mxu1 %v1459_v12 }
 0x341   : > { %v2213_v62 = vpop.eup %2212 }
 0x342   : > { %v1371_v59 = vpop.xlane.xlu1 %1370  ;;  %v1420_v19 = vmul.f32 %v2213_v62, %v3174_v29  ;;  %v1419_v21 = vmul.f32 %v2213_v62, %v3170_v36 }
 0x343   : > { %2218 = vrcp.f32 %v1371_v59 }
 0x344   : > { %v1462_v16 = vpack.c.bf16 %v1420_v19, %v1418_v50  ;;  %v1461_v6 = vpack.c.bf16 %v1419_v21, %v1417_v2 }
 0x345   : > { %v2215_v38 = vpop.eup %2214 }
 0x346   : > { %1477 = vmatprep.subr.bf16.mxu1 %v1462_v16  ;;  %v1374_v13 = vpop.xlane.xlu0 %1373  ;;  %v1422_v58 = vmul.f32 %v2215_v38, %v3188_v52  ;;  %v1421_v29 = vmul.f32 %v2215_v38, %v3186_v53 }
 0x347   : > { %2220 = vrcp.f32 %v1374_v13  ;;  %1478 = vmatpush1.bf16.xpose.msra.mxu1 %v1461_v6 }
 0x349   : > { %v2217_v18 = vpop.eup %2216 }
 0x34a   : > { %v1377_v14 = vpop.xlane.xlu1 %1376  ;;  %v1424_v30 = vmul.f32 %v2217_v18, %v3202_v49  ;;  %v1423_v9 = vmul.f32 %v2217_v18, %v3198_v51 }
 0x34b   : > { %2222 = vrcp.f32 %v1377_v14 }
 0x34c   : > { %v1464_v57 = vpack.c.bf16 %v1424_v30, %v1422_v58  ;;  %v1463_v36 = vpack.c.bf16 %v1423_v9, %v1421_v29  ;;  %v3644_v9 = vld [vmem:[#allocation13_spill] sm:$0xff] }
 0x34d   : > { %v2219_v17 = vpop.eup %2218 }
 0x34e   : > { %1479 = vmatprep.subr.bf16.mxu1 %v1464_v57  ;;  %v1380_v41 = vpop.xlane.xlu0 %1379  ;;  %v1426_v37 = vmul.f32 %v2219_v17, %v3216_v1  ;;  %v1425_v49 = vmul.f32 %v2219_v17, %v3214_v61 }
 0x34f   : > { %2224 = vrcp.f32 %v1380_v41  ;;  %1480 = vmatpush1.bf16.xpose.msra.mxu1 %v1463_v36  ;;  %v3648_v36 = vld [vmem:[#allocation33_spill] sm:$0xff]  ;;  %v3651_v41 = vld [vmem:[#allocation36_spill] sm:$0xff] }
 0x351   : > { %v2221_v15 = vpop.eup %2220 }
 0x352   : > { %v1383_v8 = vpop.xlane.xlu1 %1382  ;;  %v1428_v52 = vmul.f32 %v2221_v15, %v3230_v35  ;;  %v1427_v53 = vmul.f32 %v2221_v15, %v3226_v4  ;;  %v3653_v15 = vld [vmem:[#allocation20_spill] sm:$0xff] }
 0x353   : > { %2226 = vrcp.f32 %v1383_v8  ;;  %v3654_v8 = vld [vmem:[#allocation19_spill] sm:$0xff] }
 0x354   : > { %v1466_v12 = vpack.c.bf16 %v1428_v52, %v1426_v37  ;;  %v1465_v51 = vpack.c.bf16 %v1427_v53, %v1425_v49  ;;  %v3655_v37 = vpack.c.bf16 %v3653_v15, %v3654_v8  ;;  %v3656_v52 = vld [vmem:[#allocation24_spill] sm:$0xff]  ;;  %v3657_v49 = vld [vmem:[#allocation23_spill] sm:$0xff] }
 0x355   : > { %v2223_v43 = vpop.eup %2222  ;;  %v3658_v53 = vpack.c.bf16 %v3656_v52, %v3657_v49  ;;  %v291_v52 = vld [vmem:[#allocation5 + $0x20] sm:$0xff] }
 0x356   : > { %1481 = vmatprep.subr.bf16.mxu1 %v1466_v12  ;;  %v1386_v3 = vpop.xlane.xlu0 %1385  ;;  %v1430_v50 = vmul.f32 %v2223_v43, %v3244_v26  ;;  %v1429_v35 = vmul.f32 %v2223_v43, %v3242_v11  ;;  %v3659_v12 = vld [vmem:[#allocation22_spill] sm:$0xff] }
 0x357   : > { %2228 = vrcp.f32 %v1386_v3  ;;  %1482 = vmatpush1.bf16.xpose.msra.mxu1 %v1465_v51  ;;  %v3660_v51 = vld [vmem:[#allocation21_spill] sm:$0xff] }
 0x358   : > { %v3663_v3 = vld [vmem:[#allocation29_spill] sm:$0xff] }
 0x359   : > { %v2225_v62 = vpop.eup %2224 }
 0x35a   : > { %v1389_v59 = vpop.xlane.xlu1 %1388  ;;  %v1432_v1 = vmul.f32 %v2225_v62, %v3258_v24  ;;  %v1431_v61 = vmul.f32 %v2225_v62, %v3254_v33  ;;  %v3665_v62 = vld [vmem:[#allocation37_spill] sm:$0xff] }
 0x35b   : > { %2230 = vrcp.f32 %v1389_v59  ;;  %v3666_v59 = vld [vmem:[#allocation35_spill] sm:$0xff] }
 0x35c   : > { %v1468_v19 = vpack.c.bf16 %v1432_v1, %v1430_v50  ;;  %v1467_v4 = vpack.c.bf16 %v1431_v61, %v1429_v35  ;;  %v3667_v50 = vpack.c.bf16 %v3665_v62, %v3666_v59  ;;  %v3668_v1 = vld [vmem:[#allocation42_spill] sm:$0xff]  ;;  %v3669_v35 = vld [vmem:[#allocation40_spill] sm:$0xff]  ;;  %v293_v62 = vld [vmem:[#allocation5 + $0x30] sm:$0xff] }
 0x35d   : > { %v2227_v21 = vpop.eup %2226  ;;  %v3670_v61 = vpack.c.bf16 %v3668_v1, %v3669_v35 }
 0x35e   : > { %1483 = vmatprep.subr.bf16.mxu1 %v1468_v19  ;;  %v1392_v2 = vpop.xlane.xlu0 %1391  ;;  %v1434_v6 = vmul.f32 %v2227_v21, %v3272_v7  ;;  %v1433_v26 = vmul.f32 %v2227_v21, %v3270_v40  ;;  %v3626_v40 = vpack.c.bf16 %v2850_v55, %v2847_v56  ;;  %v3631_v56 = vpack.c.bf16 %v2874_v28, %v2871_v25  ;;  %v3632_v55 = vld [vmem:[#allocation16_spill] sm:$0xff]  ;;  %v3643_v28 = vld [vmem:[#allocation14_spill] sm:$0xff] }
 0x35f   : > { %2232 = vrcp.f32 %v1392_v2  ;;  %1484 = vmatpush1.bf16.xpose.msra.mxu1 %v1467_v4  ;;  %v3645_v57 = vpack.c.bf16 %v3643_v28, %v3644_v9  ;;  %v3671_v19 = vld [vmem:[#allocation26_spill] sm:$0xff]  ;;  %v3672_v4 = vld [vmem:[#allocation25_spill] sm:$0xff]  ;;  %v3674_v21 = vld [vmem:[#allocation32_spill] sm:$0xff] }
 0x360   : > { %v3673_v2 = vpack.c.bf16 %v3671_v19, %v3672_v4 }
 0x361   : > { %v2229_v16 = vpop.eup %2228 }
 0x362   : > { %v1436_v13 = vmul.f32 %v2229_v16, %v3284_v48  ;;  %v1435_v24 = vmul.f32 %v2229_v16, %v3280_v5  ;;  %v3627_v5 = vpack.c.bf16 %v3108_v10, %v3104_v39  ;;  %v3635_v10 = vpack.c.bf16 %v3120_v34, %v3114_v44  ;;  %v3647_v34 = vld [vmem:[#allocation34_spill] sm:$0xff]  ;;  %v3675_v16 = vld [vmem:[#allocation31_spill] sm:$0xff] }
 0x363   : > { %v3646_v44 = vpack.c.bf16 %v3036_v42, %v3033_v32  ;;  %v3661_v32 = vpack.c.bf16 %v3659_v12, %v3660_v51  ;;  %v3662_v42 = vld [vmem:[#allocation30_spill] sm:$0xff] }
 0x364   : > { %v1470_v11 = vpack.c.bf16 %v1436_v13, %v1434_v6  ;;  %v1469_v38 = vpack.c.bf16 %v1435_v24, %v1433_v26  ;;  %v3664_v43 = vpack.c.bf16 %v3662_v42, %v3663_v3  ;;  %v3676_v6 = vpack.c.bf16 %v3674_v21, %v3675_v16  ;;  %v3677_v13 = vld [vmem:[#allocation28_spill] sm:$0xff]  ;;  %v3678_v26 = vld [vmem:[#allocation27_spill] sm:$0xff]  ;;  %v295_v21 = vld [vmem:[#allocation5 + $0x40] sm:$0xff] }
 0x365   : > { %v2231_v33 = vpop.eup %2230  ;;  %v3679_v24 = vpack.c.bf16 %v3677_v13, %v3678_v26 }
 0x366   : > { %1485 = vmatprep.subr.bf16.mxu1 %v1470_v11  ;;  %v1438_v14 = vmul.f32 %v2231_v33, %v3296_v54  ;;  %v1437_v30 = vmul.f32 %v2231_v33, %v3294_v23  ;;  %v3628_v54 = vpack.c.bf16 %v3126_v47, %v3116_v60  ;;  %v3633_v23 = vld [vmem:[#allocation15_spill] sm:$0xff]  ;;  %v3641_v47 = vld [vmem:[#allocation17_spill] sm:$0xff] }
 0x367   : > { %1486 = vmatpush1.bf16.xpose.msra.mxu1 %v1469_v38  ;;  %v3634_v39 = vpack.c.bf16 %v3632_v55, %v3633_v23  ;;  %v3638_v60 = vld [vmem:[#allocation11_spill] sm:$0xff]  ;;  %v3680_v11 = vld [vmem:[#allocation41_spill] sm:$0xff]  ;;  %v3696_v55 = vld [vmem:[#allocation52_spill] sm:$0xff] }
 0x368   : > { %v3681_v38 = vld [vmem:[#allocation39_spill] sm:$0xff] }
 0x369   : > { %v2233_v18 = vpop.eup %2232  ;;  %v3682_v33 = vpack.c.bf16 %v3680_v11, %v3681_v38 }
 0x36a   : > { %v1440_v58 = vmul.f32 %v2233_v18, %v3308_v31  ;;  %v1439_v7 = vmul.f32 %v2233_v18, %v3304_v27  ;;  %v3629_v31 = vpack.c.bf16 %v2842_v0, %v2837_v45  ;;  %v3630_v27 = vpack.c.bf16 %v2868_v22, %v2857_v63  ;;  %v3637_v0 = vld [vmem:[#allocation12_spill] sm:$0xff]  ;;  %v3640_v22 = vld [vmem:[#allocation18_spill] sm:$0xff] }
 0x36b   : > { %v3636_v45 = vpack.c.bf16 %v3182_v46, %v3168_v20  ;;  %v3639_v63 = vpack.c.bf16 %v3637_v0, %v3638_v60  ;;  %v3642_v25 = vpack.c.bf16 %v3640_v22, %v3641_v47  ;;  %v3649_v20 = vpack.c.bf16 %v3647_v34, %v3648_v36  ;;  %v3650_v46 = vld [vmem:[#allocation38_spill] sm:$0xff]  ;;  %v287_v60 = vld [vmem:[#allocation5] sm:$0xff]  ;;  %v289_v34 = vld [vmem:[#allocation5 + $0x10] sm:$0xff] }
 0x36c   : > { %v1472_v29 = vpack.c.bf16 %v1440_v58, %v1438_v14  ;;  %v1471_v48 = vpack.c.bf16 %v1439_v7, %v1437_v30  ;;  %v3652_v17 = vpack.c.bf16 %v3650_v46, %v3651_v41  ;;  %v3683_v18 = vld [vmem:[#allocation46_spill] sm:$0xff]  ;;  %v3684_v14 = vld [vmem:[#allocation44_spill] sm:$0xff]  ;;  %v3686_v30 = vld [vmem:[#allocation45_spill] sm:$0xff]  ;;  %v2373_v0 = vmov 0  }
 0x36d   : > { %v3685_v58 = vpack.c.bf16 %v3683_v18, %v3684_v14  ;;  %v3687_v7 = vld [vmem:[#allocation43_spill] sm:$0xff]  ;;  %2054 = vset.pattern.permute.xlu1 %v2373_v0  ;;  %2055 = vset.pattern.permute.xlu0 %v2373_v0  ;;  %v288_v22 = vld [vmem:[#allocation5 + $0x8] sm:$0xff] }
 0x36e   : > { %1487 = vmatprep.subr.bf16.mxu1 %v1472_v29  ;;  %v3688_v29 = vpack.c.bf16 %v3686_v30, %v3687_v7  ;;  %v297_v18 = vld [vmem:[#allocation5 + $0x50] sm:$0xff] }
 0x36f   : > { %1488 = vmatpush1.bf16.xpose.msra.mxu1 %v1471_v48  ;;  %v3689_v48 = vld [vmem:[#allocation50_spill] sm:$0xff] }
 0x370   : > { %1610 = vmatprep.subr.bf16.mxu1 %v3626_v40  ;;  %v3690_v40 = vld [vmem:[#allocation48_spill] sm:$0xff] }
 0x376   : > { %1506 = vmatmul.mubr.bf16.vlgmr.msra.gmra.mrb[0].mxu1 %v3627_v5  ;;  %v3691_v5 = vpack.c.bf16 %v3689_v48, %v3690_v40 }
 0x377   : > { %1513 = vmatprep.mubr.bf16.mxu1 %v3628_v54  ;;  %1611 = vmatpush1.bf16.msra.mxu1 %v3629_v31  ;;  %v3692_v54 = vld [vmem:[#allocation49_spill] sm:$0xff]  ;;  %v3693_v31 = vld [vmem:[#allocation47_spill] sm:$0xff] }
 0x378   : > { %1612 = vmatprep.subr.bf16.mxu1 %v3630_v27  ;;  %v3694_v27 = vpack.c.bf16 %v3692_v54, %v3693_v31  ;;  %v299_v54 = vld [vmem:[#allocation5 + $0x60] sm:$0xff] }
 0x37b   : > { %1613 = vmatpush1.bf16.msra.mxu1 %v3631_v56  ;;  %v3695_v56 = vld [vmem:[#allocation54_spill] sm:$0xff] }
 0x37c   : > { %1614 = vmatprep.subr.bf16.mxu1 %v3634_v39  ;;  %v3697_v23 = vpack.c.bf16 %v3695_v56, %v3696_v55  ;;  %v3698_v39 = vld [vmem:[#allocation53_spill] sm:$0xff] }
 0x37e   : > { %1514 = vmatmul.mubr.bf16.gmra.mrb[4].mxu1 %v3635_v10  ;;  %v3699_v10 = vld [vmem:[#allocation51_spill] sm:$0xff] }
 0x37f   : > { %1521 = vmatprep.mubr.bf16.mxu1 %v3636_v45  ;;  %1615 = vmatpush1.bf16.msra.mxu1 %v3639_v63  ;;  %v3700_v45 = vpack.c.bf16 %v3698_v39, %v3699_v10 }
 0x380   : > { %1616 = vmatprep.subr.bf16.mxu1 %v3642_v25 }
 0x383   : > { %1617 = vmatpush1.bf16.msra.mxu1 %v3645_v57 }
 0x384   : > { %1618 = vmatprep.subr.bf16.mxu1 %v3646_v44 }
 0x386   : > { %1522 = vmatmul.mubr.bf16.gmra.mrb[8].mxu1 %v3649_v20  ;;  %v290_v20 = vld [vmem:[#allocation5 + $0x18] sm:$0xff] }
 0x387   : > { %1529 = vmatprep.mubr.bf16.mxu1 %v3652_v17  ;;  %1619 = vmatpush1.bf16.msra.mxu1 %v3655_v37 }
 0x388   : > { %1620 = vmatprep.subr.bf16.mxu1 %v3658_v53  ;;  %v292_v53 = vld [vmem:[#allocation5 + $0x28] sm:$0xff] }
 0x38b   : > { %1621 = vmatpush1.bf16.msra.mxu1 %v3661_v32 }
 0x38c   : > { %1622 = vmatprep.subr.bf16.mxu1 %v3664_v43 }
 0x38e   : > { %1530 = vmatmul.mubr.bf16.gmra.mrb[12].mxu1 %v3667_v50  ;;  %v294_v50 = vld [vmem:[#allocation5 + $0x38] sm:$0xff] }
 0x38f   : > { %1537 = vmatprep.mubr.bf16.mxu1 %v3670_v61  ;;  %1623 = vmatpush1.bf16.msra.mxu1 %v3673_v2 }
 0x390   : > { %1624 = vmatprep.subr.bf16.mxu1 %v3676_v6  ;;  %v296_v6 = vld [vmem:[#allocation5 + $0x48] sm:$0xff] }
 0x393   : > { %1625 = vmatpush1.bf16.msra.mxu1 %v3679_v24 }
 0x396   : > { %1538 = vmatmul.mubr.bf16.gmra.mrb[16].mxu1 %v3682_v33 }
 0x397   : > { %1545 = vmatprep.mubr.bf16.mxu1 %v3685_v58  ;;  %v298_v58 = vld [vmem:[#allocation5 + $0x58] sm:$0xff] }
 0x39e   : > { %1546 = vmatmul.mubr.bf16.gmra.mrb[20].mxu1 %v3688_v29 }
 0x39f   : > { %1553 = vmatprep.mubr.bf16.mxu1 %v3691_v5 }
 0x3a6   : > { %1554 = vmatmul.mubr.bf16.gmra.mrb[24].mxu1 %v3694_v27  ;;  %v300_v27 = vld [vmem:[#allocation5 + $0x68] sm:$0xff] }
 0x3a7   : > { %1561 = vmatprep.mubr.bf16.mxu1 %v3697_v23 }
 0x3ae   : > { %1562 = vmatmul.mubr.bf16.gmra.mrb[28].mxu1 %v3700_v45 }
 0x3af   : > { %1642 = vmatprep.mubr.bf16.mxu1 %v2373_v0 }
 0x449   : > { %v1507_v63 = vpop.f32.mrb[0].mxu1 }
 0x44a   : > { %v1509_v47 = vpop.f32.mrb[1].mxu1  ;;  %v1570_v28 = vmul.f32 %v1507_v63, %v287_v60  ;;  %v301_v60 = vld [vmem:[#allocation5 + $0x70] sm:$0xff] }
 0x44b   : > { %v1510_v25 = vpop.f32.mrb[2].mxu1 }
 0x44c   : > { %v1571_v9 = vmul.f32 %v1510_v25, %v288_v22  ;;  %v1512_v57 = vpop.f32.mrb[3].mxu1  ;;  %v302_v22 = vld [vmem:[#allocation5 + $0x78] sm:$0xff] }
 0x44e   : > { %v1586_v44 = vpack.c.bf16 %v1571_v9, %v1570_v28 }
 0x450   : > { %1643 = vmatmul.mubr.bf16.vlgmr.msra.gmra.mrb[32].mxu1 %v1586_v44 }
 0x451   : > { %v1515_v36 = vpop.f32.mrb[4].mxu1  ;;  %1652 = vmatprep.mubr.bf16.mxu1 %v2373_v0 }
 0x452   : > { %v1517_v46 = vpop.f32.mrb[5].mxu1  ;;  %v1572_v17 = vmul.f32 %v1515_v36, %v289_v34  ;;  %v303_v34 = vld [vmem:[%s3520_s3] sm:$0xf] }
 0x453   : > { %v1518_v41 = vpop.f32.mrb[6].mxu1  ;;  %v309_v36 = vld [vmem:[%s3521_s4] sm:$0xf]  ;;  %306 = vperm.xlu1 %2054, %v303_v34  }
 0x454   : > { %v1573_v15 = vmul.f32 %v1518_v41, %v290_v20  ;;  %v1520_v8 = vpop.f32.mrb[7].mxu1  ;;  %312 = vperm.xlu0 %2055, %v309_v36  }
 0x456   : > { %v1587_v37 = vpack.c.bf16 %v1573_v15, %v1572_v17 }
 0x458   : > { %1653 = vmatmul.mubr.bf16.gmra.mrb[36].mxu1 %v1587_v37 }
 0x459   : > { %v1523_v49 = vpop.f32.mrb[8].mxu1  ;;  %1662 = vmatprep.mubr.bf16.mxu1 %v2373_v0 }
 0x45a   : > { %v1525_v12 = vpop.f32.mrb[9].mxu1  ;;  %v1574_v32 = vmul.f32 %v1523_v49, %v291_v52 }
 0x45b   : > { %v1526_v51 = vpop.f32.mrb[10].mxu1 }
 0x45c   : > { %v1575_v42 = vmul.f32 %v1526_v51, %v292_v53  ;;  %v1528_v3 = vpop.f32.mrb[11].mxu1 }
 0x45e   : > { %v1588_v43 = vpack.c.bf16 %v1575_v42, %v1574_v32 }
 0x460   : > { %1663 = vmatmul.mubr.bf16.gmra.mrb[40].mxu1 %v1588_v43 }
 0x461   : > { %v1531_v59 = vpop.f32.mrb[12].mxu1  ;;  %1672 = vmatprep.mubr.bf16.mxu1 %v2373_v0 }
 0x462   : > { %v1533_v1 = vpop.f32.mrb[13].mxu1  ;;  %v1576_v61 = vmul.f32 %v1531_v59, %v293_v62 }
 0x463   : > { %v1534_v35 = vpop.f32.mrb[14].mxu1 }
 0x464   : > { %v1577_v19 = vmul.f32 %v1534_v35, %v294_v50  ;;  %v1536_v4 = vpop.f32.mrb[15].mxu1 }
 0x466   : > { %v1589_v2 = vpack.c.bf16 %v1577_v19, %v1576_v61 }
 0x468   : > { %1673 = vmatmul.mubr.bf16.gmra.mrb[44].mxu1 %v1589_v2 }
 0x469   : > { %v1539_v16 = vpop.f32.mrb[16].mxu1  ;;  %1682 = vmatprep.mubr.bf16.mxu1 %v2373_v0 }
 0x46a   : > { %v1541_v13 = vpop.f32.mrb[17].mxu1  ;;  %v1578_v24 = vmul.f32 %v1539_v16, %v295_v21 }
 0x46b   : > { %v1542_v26 = vpop.f32.mrb[18].mxu1 }
 0x46c   : > { %v1579_v11 = vmul.f32 %v1542_v26, %v296_v6  ;;  %v1544_v38 = vpop.f32.mrb[19].mxu1 }
 0x46e   : > { %v1590_v33 = vpack.c.bf16 %v1579_v11, %v1578_v24 }
 0x470   : > { %1683 = vmatmul.mubr.bf16.gmra.mrb[48].mxu1 %v1590_v33 }
 0x471   : > { %v1547_v14 = vpop.f32.mrb[20].mxu1  ;;  %1692 = vmatprep.mubr.bf16.mxu1 %v2373_v0 }
 0x472   : > { %v1549_v30 = vpop.f32.mrb[21].mxu1  ;;  %v1580_v29 = vmul.f32 %v1547_v14, %v297_v18 }
 0x473   : > { %v1550_v7 = vpop.f32.mrb[22].mxu1 }
 0x474   : > { %v1581_v48 = vmul.f32 %v1550_v7, %v298_v58  ;;  %v1552_v40 = vpop.f32.mrb[23].mxu1 }
 0x476   : > { %v1591_v5 = vpack.c.bf16 %v1581_v48, %v1580_v29 }
 0x478   : > { %1693 = vmatmul.mubr.bf16.gmra.mrb[52].mxu1 %v1591_v5 }
 0x479   : > { %v1555_v31 = vpop.f32.mrb[24].mxu1  ;;  %1702 = vmatprep.mubr.bf16.mxu1 %v2373_v0 }
 0x47a   : > { %v1557_v56 = vpop.f32.mrb[25].mxu1  ;;  %v1582_v23 = vmul.f32 %v1555_v31, %v299_v54 }
 0x47b   : > { %v1558_v55 = vpop.f32.mrb[26].mxu1  ;;  %v286_v56 = vld [vmem:[%s3519_s2] sm:$0xf] }
 0x47c   : > { %v1583_v39 = vmul.f32 %v1558_v55, %v300_v27  ;;  %v1560_v10 = vpop.f32.mrb[27].mxu1 }
 0x47e   : > { %v1592_v45 = vpack.c.bf16 %v1583_v39, %v1582_v23  ;;  %v315_v23 = vpack.c.bf16 %v286_v56, %v286_v56 }
 0x480   : > { %1703 = vmatmul.mubr.bf16.gmra.mrb[56].mxu1 %v1592_v45 }
 0x481   : > { %v1563_v63 = vpop.f32.mrb[28].mxu1  ;;  %1712 = vmatprep.mubr.bf16.mxu1 %v2373_v0 }
 0x482   : > { %v1565_v47 = vpop.f32.mrb[29].mxu1  ;;  %v1584_v28 = vmul.f32 %v1563_v63, %v301_v60 }
 0x483   : > { %v1566_v25 = vpop.f32.mrb[30].mxu1 }
 0x484   : > { %v1585_v9 = vmul.f32 %v1566_v25, %v302_v22  ;;  %v1568_v57 = vpop.f32.mrb[31].mxu1 }
 0x486   : > { %v1593_v44 = vpack.c.bf16 %v1585_v9, %v1584_v28 }
 0x488   : > { %1713 = vmatmul.mubr.bf16.gmra.mrb[60].mxu1 %v1593_v44 }
 0x489   : > { %1771 = vmatprep.mubr.bf16.mxu1 %v2373_v0 }
 0x4d2   : > { %v307_v39 = vpop.permute.xlu1 %306 }
 0x523   : > { %v1644_v20 = vpop.f32.mrb[32].mxu1 }
 0x524   : > { %v1646_v46 = vpop.f32.mrb[33].mxu1 }
 0x525   : > { %v1648_v41 = vpop.f32.mrb[34].mxu1 }
 0x526   : > { %v1723_v17 = vpack.c.bf16 %v1648_v41, %v1644_v20  ;;  %v1650_v15 = vpop.f32.mrb[35].mxu1 }
 0x527   : > { %v1724_v8 = vpack.c.bf16 %v1650_v15, %v1646_v46 }
 0x529   : > { %1739 = vmatprep.subr.bf16.mxu1 %v1724_v8 }
 0x52a   : > { %1740 = vmatpush1.bf16.msra.mxu1 %v1723_v17 }
 0x52b   : > { %v1654_v37 = vpop.f32.mrb[36].mxu1 }
 0x52c   : > { %v1656_v0 = vpop.f32.mrb[37].mxu1 }
 0x52d   : > { %v1658_v52 = vpop.f32.mrb[38].mxu1 }
 0x52e   : > { %v1725_v49 = vpack.c.bf16 %v1658_v52, %v1654_v37  ;;  %v1660_v53 = vpop.f32.mrb[39].mxu1 }
 0x52f   : > { %v1726_v12 = vpack.c.bf16 %v1660_v53, %v1656_v0 }
 0x531   : > { %1741 = vmatprep.subr.bf16.mxu1 %v1726_v12 }
 0x532   : > { %1742 = vmatpush1.bf16.msra.mxu1 %v1725_v49 }
 0x533   : > { %v1664_v51 = vpop.f32.mrb[40].mxu1 }
 0x534   : > { %v1666_v32 = vpop.f32.mrb[41].mxu1 }
 0x535   : > { %v1668_v42 = vpop.f32.mrb[42].mxu1 }
 0x536   : > { %v1727_v3 = vpack.c.bf16 %v1668_v42, %v1664_v51  ;;  %v1670_v43 = vpop.f32.mrb[43].mxu1 }
 0x537   : > { %v1728_v62 = vpack.c.bf16 %v1670_v43, %v1666_v32 }
 0x539   : > { %1743 = vmatprep.subr.bf16.mxu1 %v1728_v62 }
 0x53a   : > { %1744 = vmatpush1.bf16.msra.mxu1 %v1727_v3 }
 0x53b   : > { %v1674_v59 = vpop.f32.mrb[44].mxu1 }
 0x53c   : > { %v1676_v50 = vpop.f32.mrb[45].mxu1 }
 0x53d   : > { %v1678_v1 = vpop.f32.mrb[46].mxu1 }
 0x53e   : > { %v1729_v35 = vpack.c.bf16 %v1678_v1, %v1674_v59  ;;  %v1680_v61 = vpop.f32.mrb[47].mxu1 }
 0x53f   : > { %v1730_v19 = vpack.c.bf16 %v1680_v61, %v1676_v50 }
 0x541   : > { %1745 = vmatprep.subr.bf16.mxu1 %v1730_v19 }
 0x542   : > { %1746 = vmatpush1.bf16.msra.mxu1 %v1729_v35 }
 0x543   : > { %v1684_v4 = vpop.f32.mrb[48].mxu1 }
 0x544   : > { %v1686_v2 = vpop.f32.mrb[49].mxu1 }
 0x545   : > { %v1688_v21 = vpop.f32.mrb[50].mxu1 }
 0x546   : > { %v1731_v16 = vpack.c.bf16 %v1688_v21, %v1684_v4  ;;  %v1690_v6 = vpop.f32.mrb[51].mxu1 }
 0x547   : > { %v1732_v13 = vpack.c.bf16 %v1690_v6, %v1686_v2 }
 0x549   : > { %1747 = vmatprep.subr.bf16.mxu1 %v1732_v13 }
 0x54a   : > { %1748 = vmatpush1.bf16.msra.mxu1 %v1731_v16 }
 0x54b   : > { %v1694_v26 = vpop.f32.mrb[52].mxu1 }
 0x54c   : > { %v1696_v24 = vpop.f32.mrb[53].mxu1 }
 0x54d   : > { %v1698_v11 = vpop.f32.mrb[54].mxu1 }
 0x54e   : > { %v1733_v38 = vpack.c.bf16 %v1698_v11, %v1694_v26  ;;  %v1700_v33 = vpop.f32.mrb[55].mxu1  ;;  %v313_v11 = vpop.permute.xlu0 %312 }
 0x54f   : > { %v1734_v18 = vpack.c.bf16 %v1700_v33, %v1696_v24 }
 0x551   : > { %1749 = vmatprep.subr.bf16.mxu1 %v1734_v18 }
 0x552   : > { %1750 = vmatpush1.bf16.msra.mxu1 %v1733_v38 }
 0x553   : > { %v1704_v14 = vpop.f32.mrb[56].mxu1 }
 0x554   : > { %v1706_v58 = vpop.f32.mrb[57].mxu1 }
 0x555   : > { %v1708_v30 = vpop.f32.mrb[58].mxu1 }
 0x556   : > { %v1735_v7 = vpack.c.bf16 %v1708_v30, %v1704_v14  ;;  %v1710_v29 = vpop.f32.mrb[59].mxu1 }
 0x557   : > { %v1736_v48 = vpack.c.bf16 %v1710_v29, %v1706_v58 }
 0x559   : > { %1751 = vmatprep.subr.bf16.mxu1 %v1736_v48 }
 0x55a   : > { %1752 = vmatpush1.bf16.msra.mxu1 %v1735_v7 }
 0x55b   : > { %v1714_v40 = vpop.f32.mrb[60].mxu1 }
 0x55c   : > { %v1716_v5 = vpop.f32.mrb[61].mxu1 }
 0x55d   : > { %v1718_v54 = vpop.f32.mrb[62].mxu1 }
 0x55e   : > { %v1737_v31 = vpack.c.bf16 %v1718_v54, %v1714_v40  ;;  %v1720_v27 = vpop.f32.mrb[63].mxu1 }
 0x55f   : > { %v1738_v55 = vpack.c.bf16 %v1720_v27, %v1716_v5 }
 0x561   : > { %1753 = vmatprep.subr.bf16.mxu1 %v1738_v55 }
 0x562   : > { %1754 = vmatpush1.bf16.msra.mxu1 %v1737_v31 }
 0x565   : > { %1772 = vmatmul.mubr.bf16.vlgmr.msra.gmra.mrb[64].mxu1 %v315_v23 }
 0x638   : > { %v1773_v10 = vpop.f32.mrb[64].mxu1 }
 0x639   : > { %v1774_v45 = vadd.f32 %v1773_v10, %v307_v39  ;;  %v1775_v60 = vpop.f32.mrb[65].mxu1 }
 0x63a   : > { %v1776_v63 = vadd.f32 %v1775_v60, %v307_v39  ;;  %v1777_v22 = vpop.f32.mrb[66].mxu1 }
 0x63b   : > { %v1780_v47 = vsel %vm563_vm0, %v1774_v45, 0.0  ;;  %v1778_v25 = vpop.f32.mrb[67].mxu1 }
 0x63c   : > { %v1781_v28 = vrot.slane %v1780_v47, 4  ;;  %v1787_v9 = vsel %vm563_vm0, %v1776_v63, 0.0 }
 0x63d   : > { %v1788_v57 = vrot.slane %v1787_v9, 4 }
 0x63e   : > { %v1782_v44 = vadd.f32 %v1781_v28, %v1780_v47 }
 0x63f   : > { %v1789_v34 = vadd.f32 %v1788_v57, %v1787_v9 }
 0x640   : > { %v1783_v36 = vrot.slane %v1782_v44, 2 }
 0x641   : > { %v1790_v20 = vrot.slane %v1789_v34, 2 }
 0x642   : > { %v1784_v46 = vadd.f32 %v1783_v36, %v1782_v44 }
 0x643   : > { %v1791_v41 = vadd.f32 %v1790_v20, %v1789_v34 }
 0x644   : > { %v1785_v17 = vrot.slane %v1784_v46, 1 }
 0x645   : > { %v1792_v15 = vrot.slane %v1791_v41, 1 }
 0x646   : > { %v1786_v8 = vadd.f32 %v1785_v17, %v1784_v46 }
 0x647   : > { %v1793_v37 = vadd.f32 %v1792_v15, %v1791_v41 }
 0x648   : > { %v1795_v0 = vmul.f32 0.25, %v1786_v8 }
 0x649   : > { %v1796_v52 = vmul.f32 0.25, %v1793_v37 }
 0x64a   : > { %v1797_v49 = vsub.f32 %v1774_v45, %v1795_v0 }
 0x64b   : > { %v1798_v53 = vsub.f32 %v1776_v63, %v1796_v52 }
 0x64c   : > { %v1799_v12 = vmul.f32 %v1797_v49, %v1797_v49 }
 0x64d   : > { %v1800_v51 = vmul.f32 %v1798_v53, %v1798_v53 }
 0x64e   : > { %v1801_v32 = vsel %vm563_vm0, %v1799_v12, 0.0 }
 0x64f   : > { %v1802_v42 = vrot.slane %v1801_v32, 4  ;;  %v1808_v3 = vsel %vm563_vm0, %v1800_v51, 0.0 }
 0x650   : > { %v1809_v43 = vrot.slane %v1808_v3, 4 }
 0x651   : > { %v1803_v62 = vadd.f32 %v1802_v42, %v1801_v32 }
 0x652   : > { %v1810_v59 = vadd.f32 %v1809_v43, %v1808_v3 }
 0x653   : > { %v1804_v50 = vrot.slane %v1803_v62, 2 }
 0x654   : > { %v1811_v1 = vrot.slane %v1810_v59, 2 }
 0x655   : > { %v1805_v35 = vadd.f32 %v1804_v50, %v1803_v62 }
 0x656   : > { %v1812_v61 = vadd.f32 %v1811_v1, %v1810_v59 }
 0x657   : > { %v1806_v19 = vrot.slane %v1805_v35, 1 }
 0x658   : > { %v1813_v4 = vrot.slane %v1812_v61, 1 }
 0x659   : > { %v1807_v2 = vadd.f32 %v1806_v19, %v1805_v35 }
 0x65a   : > { %v1814_v21 = vadd.f32 %v1813_v4, %v1812_v61 }
 0x65b   : > { %v1815_v16 = vmul.f32 0.25, %v1807_v2 }
 0x65c   : > { %v1816_v6 = vmul.f32 0.25, %v1814_v21 }
 0x65d   : > { %v1817_v13 = vadd.f32 1e-05, %v1815_v16 }
 0x65e   : > { %v1818_v26 = vadd.f32 1e-05, %v1816_v6 }
 0x65f   : > { %2234 = vrsqrt.f32 %v1817_v13 }
 0x660   : > { %2236 = vrsqrt.f32 %v1818_v26 }
 0x669   : > { %v2235_v24 = vpop.eup %2234 }
 0x66a   : > { %v2237_v38 = vpop.eup %2236  ;;  %v1821_v33 = vmul.f32 %v2235_v24, %v1797_v49 }
 0x66b   : > { %v1822_v18 = vmul.f32 %v2237_v38, %v1798_v53 }
 0x66c   : > { %v1823_v14 = vmul.f32 %v1821_v33, %v313_v11 }
 0x66d   : > { %v1824_v58 = vmul.f32 %v1822_v18, %v313_v11 }
 0x66f   : > { %v1827_v30 = vcombine.low %v1823_v14, %v1824_v58 }
 0x671   : > { %1829 = vst [vmem:[%s282_s16] sm:$0xff] %v1827_v30 }
 0x672   : > { %2309 = shalt.err (!%p2306_p7)
}
 0x673   : > { %s2310_s26 = scalar_lea.hbm %s3473_s27, 128  ;;  %s2314_s18 = scalar_lea.hbm %s3523_s6, 256 }
 0x674   : > { %p2311_p9 = scmp.ne.s32.totalorder %s3473_s27, %s2310_s26  ;;  %p2315_p0 = scmp.lt.u32.totalorder %s3473_s27, %s3523_s6 }
 0x675   : > { %p2316_p11 = scmp.lt.u32.totalorder %s2314_s18, %s2310_s26  ;;  %p2318_p4 = scmp.lt.u32.totalorder %s2310_s26, %s3473_s27 }
 0x676   : > { %p2312_p2 = pnand %p2311_p9, %p2501_p12 }
 0x677   : > { %p2317_p1 = por %p2316_p11, %p2315_p0 }
 0x678   : > { %p2313_p5 = pneg %p2312_p2 }
 0x679   : > { %p2319_p6 = por %p2318_p4, %p2317_p1 }
 0x67b   : > { %p2320_p8 = pnand %p2319_p6, %p2313_p5 }
 0x67d   : > { %2323 = shalt.err (!%p2320_p8)
}
 0x67e   : > { %1999 = dma.vmem_to_hbm [thread:$0]  (%p2501_p12), %s3475_s17, 128, %s3473_s27, %s1831_s10  }
 0x67f PF: > { %s1857_s16 = sand.u32 1, %s2354_s21   ;;  %p3701_p10 = scmp.ne.s32.totalorder %s3572_s28, 0 }
 0x680   : > { %p3702_p13 = scmp.ge.s32.totalorder %s2366_s24, 2  ;;  %s1858_s29 = scalar_lea.sflag [#allocation4], %s1857_s16 }
 0x682   : > { %p2010_p3 = pnand %p3702_p13, %p3701_p10 }
 0x684   : > { %2349 = dma.done.wait (!%p2010_p3), %s1858_s29, 128  }
 0x685   : > { %2351 = vsyncadd (!%p2010_p3), %s1858_s29, 4294967168  ;;  %p20_p7 = scmp.ge.s32.totalorder %s2466_s9, 4   ;;  %s3703_s21 = smov %s2358_s22 }
 0x686   : > { %s3704_s22 = smov %s2362_s23  ;;  %s3705_s23 = smov %s2497_s13 }
 0x687   : > { %s3706_s24 = smov %s2466_s9  ;;  %22 = sbr.rel (!%p20_p7) target bundleno = 6 (0x6), region = 93 }
 0x68e   :  { %1863 = vsyncpa [#allocation3], 1 }
 0x68f   :  { %1865 = vsyncpa [#allocation3 + $0x1], 1 }
 0x690   :  { %1866 = vsyncpa [#allocation6], 1 }
 0x691   :  { %1867 = vsyncpa [#allocation4], 1 }
 0x692   :  { %1869 = vsyncpa [#allocation4 + $0x1], 1 }

</bundles_post_ra>
